<compile_context>
chip_gen: v6e
topology: v6e:2x2x1
jax: 0.10.0
libtpu: 0.0.40
codegen_flags: <defaults>
</compile_context>

<pallas_src>
import jax
import jax.numpy as jnp
from jax import lax
from jax.experimental import pallas as pl
from jax.experimental.pallas import tpu as pltpu

HIDDEN = 768  # BERT hidden size, fixed by the module


def _round_up(x, m):
    return ((x + m - 1) // m) * m


def _cdiv(a, b):
    return (a + b - 1) // b


def _vmem_cap_bytes():
    # Per-generation cap: ~80% of physical VMEM (≈102 MiB on v5e/v6e's
    # 128 MiB, ≈51 MiB on v7x's 64 MiB). Conservative fallback if the query
    # is unavailable.
    try:
        phys = pltpu.get_tpu_info().vmem_capacity_bytes
    except Exception:
        phys = 64 << 20
    return int(phys * 0.8)


def fused_embed_fc_argmax_kernel(ids_ref, emb_ref, w_ref, b_ref,
                                 logits_ref, yhat_ref,
                                 enc_ref, max_ref, arg_ref):
    """One (row-tile i, vocab-tile j) grid step.

    ids_ref    : (tm, 1)  int32  token ids for this row tile
    emb_ref    : (tv, H)  bf16   encoder stand-in embedding table (resident)
    w_ref      : (H, tn)  bf16   fc weight tile (streamed over vocab axis)
    b_ref      : (1, tn)  f32    fc bias tile (padded cols are -inf)
    logits_ref : (tm, tn) f32    logits tile
    yhat_ref   : (1, tm)  int32  lane-dense argmax tile (written on last j)
    enc_ref    : (tm, H)  bf16   scratch: cached encoder output for this tile
    max_ref    : (1, tm)  f32    scratch: running row max over vocab tiles
    arg_ref    : (1, tm)  int32  scratch: running row argmax over vocab tiles
    """
    j = pl.program_id(1)
    nj = pl.num_programs(1)
    tm = enc_ref.shape[0]
    tv = emb_ref.shape[0]
    tn = w_ref.shape[1]

    # Encoder stand-in: one-hot MXU gather, computed once per row tile and
    # cached in VMEM. Out-of-range / padded ids yield an all-zero row.
    @pl.when(j == 0)
    def _():
        ids = ids_ref[...]                                        # (tm, 1)
        tok = lax.broadcasted_iota(jnp.int32, (tm, tv), 1)
        onehot = (ids == tok).astype(emb_ref.dtype)               # (tm, tv)
        enc_ref[...] = jnp.dot(
            onehot, emb_ref[...], preferred_element_type=jnp.float32
        ).astype(enc_ref.dtype)

    # fc head for this vocab tile: bf16 x bf16 -> f32 accumulation on the MXU.
    logits = jnp.dot(enc_ref[...], w_ref[...],
                     preferred_element_type=jnp.float32) + b_ref[...]
    logits_ref[...] = logits.astype(logits_ref.dtype)

    # Running (max, argmax) over vocab tiles. First-occurrence semantics:
    # within a tile via min-of-matching-columns, across tiles via strict '>'.
    col = j * tn + lax.broadcasted_iota(jnp.int32, (tm, tn), 1)
    row_max = jnp.max(logits, axis=-1, keepdims=True)             # (tm, 1)
    big = jnp.iinfo(jnp.int32).max
    loc_arg = jnp.min(jnp.where(logits == row_max, col, big), axis=-1)[None, :]
    loc_max = jnp.max(logits, axis=-1)[None, :]                   # (1, tm)

    @pl.when(j == 0)
    def _():
        max_ref[...] = loc_max
        arg_ref[...] = loc_arg

    @pl.when(j > 0)
    def _():
        upd = loc_max > max_ref[...]
        max_ref[...] = jnp.where(upd, loc_max, max_ref[...])
        arg_ref[...] = jnp.where(upd, loc_arg, arg_ref[...])

    @pl.when(j == nj - 1)
    def _():
        yhat_ref[...] = arg_ref[...]                              # lane-dense


def net_forward(x, y, emb_table, fc_w, fc_b, *, tm=256, tn=512,
                logits_dtype=jnp.float32):
    """Mirrors Net.forward(x, y) -> (logits, y, y_hat).

    x, y      : (N, T) int32 token ids / labels
    emb_table : (token_vocab, 768)  stand-in for the BERT encoder
    fc_w      : (V, 768)            torch nn.Linear weight layout
    fc_b      : (V,)
    logits_dtype: jnp.float32 (default) or jnp.bfloat16 to halve the logits
                  HBM writeback (v5e); argmax is computed on f32 either way.
    """
    n, t = x.shape
    v = fc_w.shape[0]
    tv, hidden = emb_table.shape
    assert hidden == HIDDEN
    m = n * t

    # Row tiling: follow the actual batch for small m (no forced 256-row pad);
    # split large single-tile batches so the "parallel" row axis has >= 2
    # steps for v7x's two TensorCores.
    tm_eff = _round_up(min(tm, m), 16)
    if m > 256 and _cdiv(m, tm_eff) < 2:
        tm_eff = _round_up(_cdiv(m, 2), 16)
    m_pad = _round_up(m, tm_eff)
    grid_rows = m_pad // tm_eff

    # Vocab tiling: multiples of 256 keep the 256-wide MXU N dim full on
    # v6e/v7x; tiny vocabs use a single 128-multiple tile.
    if v >= 256:
        tn_eff = min(tn, _round_up(v, 256))
    else:
        tn_eff = v
    tn_eff = _round_up(tn_eff, 128)
    v_pad = _round_up(v, tn_eff)
    grid_vocab = v_pad // tn_eff

    ids = x.reshape(m).astype(jnp.int32)
    ids = jnp.pad(ids, (0, m_pad - m)).reshape(m_pad, 1)

    emb_bf16 = emb_table.astype(jnp.bfloat16)                     # (tv, H)
    w_bf16 = jnp.pad(fc_w.T.astype(jnp.bfloat16),
                     ((0, 0), (0, v_pad - v)))                    # (H, Vp)
    # Padded vocab columns get -inf bias so they can never win the argmax.
    b = jnp.pad(fc_b.astype(jnp.float32), (0, v_pad - v),
                constant_values=float("-inf")).reshape(1, v_pad)

    logits_bytes = jnp.dtype(logits_dtype).itemsize

    def _run(single_buffer_table):
        table_bufs = 1 if single_buffer_table else 2
        # Real footprint, computed once (buffer counts included exactly).
        footprint = (
            2 * tm_eff * 4                          # ids tiles (int32)
            + table_bufs * tv * HIDDEN * 2          # embedding table (bf16)
            + 2 * HIDDEN * tn_eff * 2               # fc weight tiles (bf16)
            + 2 * tn_eff * 4                        # bias tiles (f32)
            + 2 * tm_eff * tn_eff * logits_bytes    # logits output tiles
            + 2 * tm_eff * 4                        # y_hat output tiles
            + tm_eff * HIDDEN * 2                   # enc scratch (bf16)
            + 2 * tm_eff * 4                        # running max/arg scratch
        )
        vmem_limit = max(min(footprint + (4 << 20), _vmem_cap_bytes()),
                         2 << 20)

        if single_buffer_table:
            # Constant block index -> DMA'd once; single buffer halves its
            # resident footprint (matters at the real ~46 MiB table size).
            emb_spec = pl.BlockSpec((tv, HIDDEN), lambda i, j: (0, 0),
                                    pipeline_mode=pl.Buffered(1))
        else:
            emb_spec = pl.BlockSpec((tv, HIDDEN), lambda i, j: (0, 0))

        call = pl.pallas_call(
            fused_embed_fc_argmax_kernel,
            out_shape=(
                jax.ShapeDtypeStruct((m_pad, v_pad), logits_dtype),
                jax.ShapeDtypeStruct((grid_rows, tm_eff), jnp.int32),
            ),
            grid_spec=pltpu.PrefetchScalarGridSpec(
                num_scalar_prefetch=0,
                grid=(grid_rows, grid_vocab),
                in_specs=[
                    pl.BlockSpec((tm_eff, 1), lambda i, j: (i, 0)),    # ids
                    emb_spec,                                          # table
                    pl.BlockSpec((HIDDEN, tn_eff), lambda i, j: (0, j)),
                    pl.BlockSpec((1, tn_eff), lambda i, j: (0, j)),
                ],
                out_specs=[
                    pl.BlockSpec((tm_eff, tn_eff), lambda i, j: (i, j)),
                    pl.BlockSpec((1, tm_eff), lambda i, j: (i, 0)),
                ],
                scratch_shapes=[
                    pltpu.VMEM((tm_eff, HIDDEN), jnp.bfloat16),  # enc cache
                    pltpu.VMEM((1, tm_eff), jnp.float32),        # running max
                    pltpu.VMEM((1, tm_eff), jnp.int32),          # running arg
                ],
            ),
            compiler_params=pltpu.CompilerParams(
                dimension_semantics=("parallel", "arbitrary"),
                vmem_limit_bytes=vmem_limit,
            ),
        )
        return jax.block_until_ready(call(ids, emb_bf16, w_bf16, b))

    try:
        logits_flat, yhat_flat = _run(True)
    except Exception:
        # Fallback if this jax build rejects pl.Buffered(1) on a top-level
        # pallas_call pipeline; costs one extra resident copy of the table.
        logits_flat, yhat_flat = _run(False)

    logits = logits_flat[:m, :v].reshape(n, t, v)
    y_hat = yhat_flat.reshape(m_pad)[:m].reshape(n, t)
    return logits, y, y_hat


if __name__ == "__main__":
    # Small, module-consistent shapes: N=2, T=8, hidden=768 (fixed), V=128.
    N, T = 2, 8
    TOKEN_VOCAB = 64     # stand-in token-id space for the embedding lookup
    VOCAB = 128          # `vocab_size` of the fc head

    key = jax.random.PRNGKey(0)
    kx, ky, ke, kw, kb = jax.random.split(key, 5)

    x = jax.random.randint(kx, (N, T), 0, TOKEN_VOCAB, dtype=jnp.int32)
    y = jax.random.randint(ky, (N, T), 0, VOCAB, dtype=jnp.int32)

    emb_table = jax.random.normal(ke, (TOKEN_VOCAB, HIDDEN), jnp.float32) * 0.02
    fc_w = jax.random.normal(kw, (VOCAB, HIDDEN), jnp.float32) * 0.02
    fc_b = jax.random.normal(kb, (VOCAB,), jnp.float32) * 0.02

    logits, y_out, y_hat = net_forward(x, y, emb_table, fc_w, fc_b)
    jax.block_until_ready((logits, y_out, y_hat))

    # Sanity check against a plain-JAX reference using the same bf16 inputs.
    enc_ref = emb_table.astype(jnp.bfloat16)[x].astype(jnp.float32)
    logits_ref = (
        jnp.dot(enc_ref.reshape(N * T, HIDDEN).astype(jnp.bfloat16),
                fc_w.T.astype(jnp.bfloat16),
                preferred_element_type=jnp.float32).reshape(N, T, VOCAB)
        + fc_b
    )
    assert logits.shape == (N, T, VOCAB) and y_hat.shape == (N, T)
    assert jnp.allclose(logits, logits_ref, atol=1e-3, rtol=1e-3)
    # Module semantics: y_hat is the argmax of the returned logits.
    assert jnp.array_equal(y_hat, jnp.argmax(logits, axis=-1).astype(y_hat.dtype))
    assert jnp.array_equal(y_out, y)

    print("KERNEL_OK")
</pallas_src>

<mosaic_0001>
module attributes {stable_mosaic.version = 11 : i64} {
  func.func @fused_embed_fc_argmax_kernel(%arg0: i32, %arg1: i32, %arg2: memref<16x1xi32, #tpu.memory_space<vmem>>, %arg3: memref<64x768xbf16, #tpu.memory_space<vmem>>, %arg4: memref<768x128xbf16, #tpu.memory_space<vmem>>, %arg5: memref<1x128xf32, #tpu.memory_space<vmem>>, %arg6: memref<16x128xf32, #tpu.memory_space<vmem>>, %arg7: memref<1x16xi32, #tpu.memory_space<vmem>>, %arg8: memref<16x768xbf16, #tpu.memory_space<vmem>>, %arg9: memref<1x16xf32, #tpu.memory_space<vmem>>, %arg10: memref<1x16xi32, #tpu.memory_space<vmem>>) attributes {dimension_semantics = [#tpu.dimension_semantics<parallel>, #tpu.dimension_semantics<arbitrary>], iteration_bounds = array<i64: 1, 1>, scalar_prefetch = 0 : i64, scratch_operands = 3 : i64, tpu.core_type = #tpu.core_type<tc>, window_params = [{transform_indices = @transform_0, window_bounds = array<i64: 16, 1>}, {pipeline_mode = #tpu.pipeline_mode<synchronous>, transform_indices = @transform_1, window_bounds = array<i64: 64, 768>}, {transform_indices = @transform_2, window_bounds = array<i64: 768, 128>}, {transform_indices = @transform_3, window_bounds = array<i64: 1, 128>}, {transform_indices = @transform_4, window_bounds = array<i64: 16, 128>}, {transform_indices = @transform_5, window_bounds = array<i64: 1, 16>}]} {
    %c0_i32 = arith.constant 0 : i32
    %0 = arith.cmpi eq, %arg1, %c0_i32 : i32
    %1 = arith.extui %0 : i1 to i32
    %c0_i32_0 = arith.constant 0 : i32
    %2 = arith.cmpi ne, %1, %c0_i32_0 : i32
    scf.if %2 {
      %c0_17 = arith.constant 0 : index
      %c0_18 = arith.constant 0 : index
      %33 = vector.load %arg2[%c0_17, %c0_18] : memref<16x1xi32, #tpu.memory_space<vmem>>, vector<16x1xi32>
      %34 = tpu.iota {dimensions = array<i32: 1>} : vector<16x64xi32>
      %35 = vector.broadcast %33 : vector<16x1xi32> to vector<16x64xi32>
      %36 = arith.cmpi eq, %35, %34 : vector<16x64xi32>
      %37 = arith.extui %36 : vector<16x64xi1> to vector<16x64xi32>
      %38 = arith.sitofp %37 : vector<16x64xi32> to vector<16x64xf32>
      %39 = arith.truncf %38 : vector<16x64xf32> to vector<16x64xbf16>
      %c0_19 = arith.constant 0 : index
      %c0_20 = arith.constant 0 : index
      %40 = vector.load %arg3[%c0_19, %c0_20] : memref<64x768xbf16, #tpu.memory_space<vmem>>, vector<64x768xbf16>
      %cst_21 = arith.constant dense<0.000000e+00> : vector<16x768xf32>
      %41 = tpu.matmul %39, %40, %cst_21 {dimension_numbers = #tpu.dot_dimension_numbers<[1], [0], [0], [1], [0, 0, 1, 1], [], []>} : vector<16x64xbf16>, vector<64x768xbf16>, vector<16x768xf32> -> vector<16x768xf32>
      %42 = arith.truncf %41 : vector<16x768xf32> to vector<16x768xbf16>
      %c0_22 = arith.constant 0 : index
      %c0_23 = arith.constant 0 : index
      %43 = vector.load %arg8[%c0_22, %c0_23] : memref<16x768xbf16, #tpu.memory_space<vmem>>, vector<16x768xbf16>
      tpu.vector_store %arg8[%c0_22, %c0_23], %42 {strides = array<i32>} : memref<16x768xbf16, #tpu.memory_space<vmem>>, vector<16x768xbf16>,
    } else {
    }
    %c0 = arith.constant 0 : index
    %c0_1 = arith.constant 0 : index
    %3 = vector.load %arg8[%c0, %c0_1] : memref<16x768xbf16, #tpu.memory_space<vmem>>, vector<16x768xbf16>
    %c0_2 = arith.constant 0 : index
    %c0_3 = arith.constant 0 : index
    %4 = vector.load %arg4[%c0_2, %c0_3] : memref<768x128xbf16, #tpu.memory_space<vmem>>, vector<768x128xbf16>
    %cst = arith.constant dense<0.000000e+00> : vector<16x128xf32>
    %5 = tpu.matmul %3, %4, %cst {dimension_numbers = #tpu.dot_dimension_numbers<[1], [0], [0], [1], [0, 0, 1, 1], [], []>} : vector<16x768xbf16>, vector<768x128xbf16>, vector<16x128xf32> -> vector<16x128xf32>
    %c0_4 = arith.constant 0 : index
    %c0_5 = arith.constant 0 : index
    %6 = vector.load %arg5[%c0_4, %c0_5] : memref<1x128xf32, #tpu.memory_space<vmem>>, vector<1x128xf32>
    %7 = vector.broadcast %6 : vector<1x128xf32> to vector<16x128xf32>
    %8 = arith.addf %5, %7 : vector<16x128xf32>
    %c0_6 = arith.constant 0 : index
    %c0_7 = arith.constant 0 : index
    %9 = vector.load %arg6[%c0_6, %c0_7] : memref<16x128xf32, #tpu.memory_space<vmem>>, vector<16x128xf32>
    tpu.vector_store %arg6[%c0_6, %c0_7], %8 {strides = array<i32>} : memref<16x128xf32, #tpu.memory_space<vmem>>, vector<16x128xf32>,
    %c128_i32 = arith.constant 128 : i32
    %10 = arith.muli %arg1, %c128_i32 : i32
    %11 = tpu.iota {dimensions = array<i32: 1>} : vector<16x128xi32>
    %12 = vector.broadcast %10 : i32 to vector<16x128xi32>
    %13 = arith.addi %12, %11 : vector<16x128xi32>
    %cst_8 = arith.constant dense<0xFF800000> : vector<16xf32>
    %14 = vector.multi_reduction <maximumf>, %8, %cst_8 [1] : vector<16x128xf32> to vector<16xf32>
    %15 = vector.shape_cast %14 : vector<16xf32> to vector<16x1xf32>
    %16 = vector.broadcast %15 : vector<16x1xf32> to vector<16x128xf32>
    %17 = arith.cmpf oeq, %8, %16 : vector<16x128xf32>
    %c2147483647_i32 = arith.constant 2147483647 : i32
    %18 = vector.broadcast %c2147483647_i32 : i32 to vector<16x128xi32>
    %19 = arith.select %17, %13, %18 : vector<16x128xi1>, vector<16x128xi32>
    %cst_9 = arith.constant dense<2147483647> : vector<16xi32>
    %20 = vector.multi_reduction <minsi>, %19, %cst_9 [1] : vector<16x128xi32> to vector<16xi32>
    %21 = vector.shape_cast %20 : vector<16xi32> to vector<1x16xi32>
    %cst_10 = arith.constant dense<0xFF800000> : vector<16xf32>
    %22 = vector.multi_reduction <maximumf>, %8, %cst_10 [1] : vector<16x128xf32> to vector<16xf32>
    %23 = vector.shape_cast %22 : vector<16xf32> to vector<1x16xf32>
    %c0_i32_11 = arith.constant 0 : i32
    %24 = arith.cmpi eq, %arg1, %c0_i32_11 : i32
    %25 = arith.extui %24 : i1 to i32
    %c0_i32_12 = arith.constant 0 : i32
    %26 = arith.cmpi ne, %25, %c0_i32_12 : i32
    scf.if %26 {
      %c0_17 = arith.constant 0 : index
      %c0_18 = arith.constant 0 : index
      %33 = vector.load %arg9[%c0_17, %c0_18] : memref<1x16xf32, #tpu.memory_space<vmem>>, vector<1x16xf32>
      tpu.vector_store %arg9[%c0_17, %c0_18], %23 {strides = array<i32>} : memref<1x16xf32, #tpu.memory_space<vmem>>, vector<1x16xf32>,
      %c0_19 = arith.constant 0 : index
      %c0_20 = arith.constant 0 : index
      %34 = vector.load %arg10[%c0_19, %c0_20] : memref<1x16xi32, #tpu.memory_space<vmem>>, vector<1x16xi32>
      tpu.vector_store %arg10[%c0_19, %c0_20], %21 {strides = array<i32>} : memref<1x16xi32, #tpu.memory_space<vmem>>, vector<1x16xi32>,
    } else {
    }
    %c0_i32_13 = arith.constant 0 : i32
    %27 = arith.cmpi sgt, %arg1, %c0_i32_13 : i32
    %28 = arith.extui %27 : i1 to i32
    %c0_i32_14 = arith.constant 0 : i32
    %29 = arith.cmpi ne, %28, %c0_i32_14 : i32
    scf.if %29 {
      %c0_17 = arith.constant 0 : index
      %c0_18 = arith.constant 0 : index
      %33 = vector.load %arg9[%c0_17, %c0_18] : memref<1x16xf32, #tpu.memory_space<vmem>>, vector<1x16xf32>
      %34 = arith.cmpf ogt, %23, %33 : vector<1x16xf32>
      %c0_19 = arith.constant 0 : index
      %c0_20 = arith.constant 0 : index
      %35 = vector.load %arg9[%c0_19, %c0_20] : memref<1x16xf32, #tpu.memory_space<vmem>>, vector<1x16xf32>
      %36 = arith.select %34, %23, %35 : vector<1x16xi1>, vector<1x16xf32>
      %c0_21 = arith.constant 0 : index
      %c0_22 = arith.constant 0 : index
      %37 = vector.load %arg9[%c0_21, %c0_22] : memref<1x16xf32, #tpu.memory_space<vmem>>, vector<1x16xf32>
      tpu.vector_store %arg9[%c0_21, %c0_22], %36 {strides = array<i32>} : memref<1x16xf32, #tpu.memory_space<vmem>>, vector<1x16xf32>,
      %c0_23 = arith.constant 0 : index
      %c0_24 = arith.constant 0 : index
      %38 = vector.load %arg10[%c0_23, %c0_24] : memref<1x16xi32, #tpu.memory_space<vmem>>, vector<1x16xi32>
      %39 = arith.select %34, %21, %38 : vector<1x16xi1>, vector<1x16xi32>
      %c0_25 = arith.constant 0 : index
      %c0_26 = arith.constant 0 : index
      %40 = vector.load %arg10[%c0_25, %c0_26] : memref<1x16xi32, #tpu.memory_space<vmem>>, vector<1x16xi32>
      tpu.vector_store %arg10[%c0_25, %c0_26], %39 {strides = array<i32>} : memref<1x16xi32, #tpu.memory_space<vmem>>, vector<1x16xi32>,
    } else {
    }
    %c0_i32_15 = arith.constant 0 : i32
    %30 = arith.cmpi eq, %arg1, %c0_i32_15 : i32
    %31 = arith.extui %30 : i1 to i32
    %c0_i32_16 = arith.constant 0 : i32
    %32 = arith.cmpi ne, %31, %c0_i32_16 : i32
    scf.if %32 {
      %c0_17 = arith.constant 0 : index
      %c0_18 = arith.constant 0 : index
      %33 = vector.load %arg10[%c0_17, %c0_18] : memref<1x16xi32, #tpu.memory_space<vmem>>, vector<1x16xi32>
      %c0_19 = arith.constant 0 : index
      %c0_20 = arith.constant 0 : index
      %34 = vector.load %arg7[%c0_19, %c0_20] : memref<1x16xi32, #tpu.memory_space<vmem>>, vector<1x16xi32>
      tpu.vector_store %arg7[%c0_19, %c0_20], %33 {strides = array<i32>} : memref<1x16xi32, #tpu.memory_space<vmem>>, vector<1x16xi32>,
    } else {
    }
    return
  }
  func.func @transform_0(%arg0: i32, %arg1: i32) -> (i32, i32) {
    %c0_i32 = arith.constant 0 : i32
    %c0_i32_0 = arith.constant 0 : i32
    return %arg0, %c0_i32 : i32, i32
  }
  func.func @transform_1(%arg0: i32, %arg1: i32) -> (i32, i32) {
    %c0_i32 = arith.constant 0 : i32
    %c0_i32_0 = arith.constant 0 : i32
    %c0_i32_1 = arith.constant 0 : i32
    return %c0_i32, %c0_i32_0 : i32, i32
  }
  func.func @transform_2(%arg0: i32, %arg1: i32) -> (i32, i32) {
    %c0_i32 = arith.constant 0 : i32
    %c0_i32_0 = arith.constant 0 : i32
    return %c0_i32, %arg1 : i32, i32
  }
  func.func @transform_3(%arg0: i32, %arg1: i32) -> (i32, i32) {
    %c0_i32 = arith.constant 0 : i32
    %c0_i32_0 = arith.constant 0 : i32
    return %c0_i32, %arg1 : i32, i32
  }
  func.func @transform_4(%arg0: i32, %arg1: i32) -> (i32, i32) {
    %c0_i32 = arith.constant 0 : i32
    return %arg0, %arg1 : i32, i32
  }
  func.func @transform_5(%arg0: i32, %arg1: i32) -> (i32, i32) {
    %c0_i32 = arith.constant 0 : i32
    %c0_i32_0 = arith.constant 0 : i32
    return %arg0, %c0_i32 : i32, i32
  }
}

module attributes {stable_mosaic.version = 11 : i64} {
  func.func @fused_embed_fc_argmax_kernel(%arg0: i32, %arg1: i32, %arg2: memref<16x1xi32, #tpu.memory_space<vmem>>, %arg3: memref<64x768xbf16, #tpu.memory_space<vmem>>, %arg4: memref<768x128xbf16, #tpu.memory_space<vmem>>, %arg5: memref<1x128xf32, #tpu.memory_space<vmem>>, %arg6: memref<16x128xf32, #tpu.memory_space<vmem>>, %arg7: memref<1x16xi32, #tpu.memory_space<vmem>>, %arg8: memref<16x768xbf16, #tpu.memory_space<vmem>>, %arg9: memref<1x16xf32, #tpu.memory_space<vmem>>, %arg10: memref<1x16xi32, #tpu.memory_space<vmem>>) attributes {dimension_semantics = [#tpu.dimension_semantics<parallel>, #tpu.dimension_semantics<arbitrary>], iteration_bounds = array<i64: 1, 1>, scalar_prefetch = 0 : i64, scratch_operands = 3 : i64, tpu.core_type = #tpu.core_type<tc>, window_params = [{transform_indices = @transform_0, window_bounds = array<i64: 16, 1>}, {pipeline_mode = #tpu.pipeline_mode<synchronous>, transform_indices = @transform_1, window_bounds = array<i64: 64, 768>}, {transform_indices = @transform_2, window_bounds = array<i64: 768, 128>}, {transform_indices = @transform_3, window_bounds = array<i64: 1, 128>}, {transform_indices = @transform_4, window_bounds = array<i64: 16, 128>}, {transform_indices = @transform_5, window_bounds = array<i64: 1, 16>}]} {
    %c0_i32 = arith.constant 0 : i32
    %0 = arith.cmpi eq, %arg1, %c0_i32 : i32
    %1 = arith.extui %0 : i1 to i32
    %c0_i32_0 = arith.constant 0 : i32
    %2 = arith.cmpi ne, %1, %c0_i32_0 : i32
    scf.if %2 {
      %c0_17 = arith.constant 0 : index
      %c0_18 = arith.constant 0 : index
      %33 = vector.load %arg2[%c0_17, %c0_18] : memref<16x1xi32, #tpu.memory_space<vmem>>, vector<16x1xi32>
      %34 = tpu.iota {dimensions = array<i32: 1>} : vector<16x64xi32>
      %35 = vector.broadcast %33 : vector<16x1xi32> to vector<16x64xi32>
      %36 = arith.cmpi eq, %35, %34 : vector<16x64xi32>
      %37 = arith.extui %36 : vector<16x64xi1> to vector<16x64xi32>
      %38 = arith.sitofp %37 : vector<16x64xi32> to vector<16x64xf32>
      %39 = arith.truncf %38 : vector<16x64xf32> to vector<16x64xbf16>
      %c0_19 = arith.constant 0 : index
      %c0_20 = arith.constant 0 : index
      %40 = vector.load %arg3[%c0_19, %c0_20] : memref<64x768xbf16, #tpu.memory_space<vmem>>, vector<64x768xbf16>
      %cst_21 = arith.constant dense<0.000000e+00> : vector<16x768xf32>
      %41 = tpu.matmul %39, %40, %cst_21 {dimension_numbers = #tpu.dot_dimension_numbers<[1], [0], [0], [1], [0, 0, 1, 1], [], []>} : vector<16x64xbf16>, vector<64x768xbf16>, vector<16x768xf32> -> vector<16x768xf32>
      %42 = arith.truncf %41 : vector<16x768xf32> to vector<16x768xbf16>
      %c0_22 = arith.constant 0 : index
      %c0_23 = arith.constant 0 : index
      %43 = vector.load %arg8[%c0_22, %c0_23] : memref<16x768xbf16, #tpu.memory_space<vmem>>, vector<16x768xbf16>
      tpu.vector_store %arg8[%c0_22, %c0_23], %42 {strides = array<i32>} : memref<16x768xbf16, #tpu.memory_space<vmem>>, vector<16x768xbf16>,
    } else {
    }
    %c0 = arith.constant 0 : index
    %c0_1 = arith.constant 0 : index
    %3 = vector.load %arg8[%c0, %c0_1] : memref<16x768xbf16, #tpu.memory_space<vmem>>, vector<16x768xbf16>
    %c0_2 = arith.constant 0 : index
    %c0_3 = arith.constant 0 : index
    %4 = vector.load %arg4[%c0_2, %c0_3] : memref<768x128xbf16, #tpu.memory_space<vmem>>, vector<768x128xbf16>
    %cst = arith.constant dense<0.000000e+00> : vector<16x128xf32>
    %5 = tpu.matmul %3, %4, %cst {dimension_numbers = #tpu.dot_dimension_numbers<[1], [0], [0], [1], [0, 0, 1, 1], [], []>} : vector<16x768xbf16>, vector<768x128xbf16>, vector<16x128xf32> -> vector<16x128xf32>
    %c0_4 = arith.constant 0 : index
    %c0_5 = arith.constant 0 : index
    %6 = vector.load %arg5[%c0_4, %c0_5] : memref<1x128xf32, #tpu.memory_space<vmem>>, vector<1x128xf32>
    %7 = vector.broadcast %6 : vector<1x128xf32> to vector<16x128xf32>
    %8 = arith.addf %5, %7 : vector<16x128xf32>
    %c0_6 = arith.constant 0 : index
    %c0_7 = arith.constant 0 : index
    %9 = vector.load %arg6[%c0_6, %c0_7] : memref<16x128xf32, #tpu.memory_space<vmem>>, vector<16x128xf32>
    tpu.vector_store %arg6[%c0_6, %c0_7], %8 {strides = array<i32>} : memref<16x128xf32, #tpu.memory_space<vmem>>, vector<16x128xf32>,
    %c128_i32 = arith.constant 128 : i32
    %10 = arith.muli %arg1, %c128_i32 : i32
    %11 = tpu.iota {dimensions = array<i32: 1>} : vector<16x128xi32>
    %12 = vector.broadcast %10 : i32 to vector<16x128xi32>
    %13 = arith.addi %12, %11 : vector<16x128xi32>
    %cst_8 = arith.constant dense<0xFF800000> : vector<16xf32>
    %14 = vector.multi_reduction <maximumf>, %8, %cst_8 [1] : vector<16x128xf32> to vector<16xf32>
    %15 = vector.shape_cast %14 : vector<16xf32> to vector<16x1xf32>
    %16 = vector.broadcast %15 : vector<16x1xf32> to vector<16x128xf32>
    %17 = arith.cmpf oeq, %8, %16 : vector<16x128xf32>
    %c2147483647_i32 = arith.constant 2147483647 : i32
    %18 = vector.broadcast %c2147483647_i32 : i32 to vector<16x128xi32>
    %19 = arith.select %17, %13, %18 : vector<16x128xi1>, vector<16x128xi32>
    %cst_9 = arith.constant dense<2147483647> : vector<16xi32>
    %20 = vector.multi_reduction <minsi>, %19, %cst_9 [1] : vector<16x128xi32> to vector<16xi32>
    %21 = vector.shape_cast %20 : vector<16xi32> to vector<1x16xi32>
    %cst_10 = arith.constant dense<0xFF800000> : vector<16xf32>
    %22 = vector.multi_reduction <maximumf>, %8, %cst_10 [1] : vector<16x128xf32> to vector<16xf32>
    %23 = vector.shape_cast %22 : vector<16xf32> to vector<1x16xf32>
    %c0_i32_11 = arith.constant 0 : i32
    %24 = arith.cmpi eq, %arg1, %c0_i32_11 : i32
    %25 = arith.extui %24 : i1 to i32
    %c0_i32_12 = arith.constant 0 : i32
    %26 = arith.cmpi ne, %25, %c0_i32_12 : i32
    scf.if %26 {
      %c0_17 = arith.constant 0 : index
      %c0_18 = arith.constant 0 : index
      %33 = vector.load %arg9[%c0_17, %c0_18] : memref<1x16xf32, #tpu.memory_space<vmem>>, vector<1x16xf32>
      tpu.vector_store %arg9[%c0_17, %c0_18], %23 {strides = array<i32>} : memref<1x16xf32, #tpu.memory_space<vmem>>, vector<1x16xf32>,
      %c0_19 = arith.constant 0 : index
      %c0_20 = arith.constant 0 : index
      %34 = vector.load %arg10[%c0_19, %c0_20] : memref<1x16xi32, #tpu.memory_space<vmem>>, vector<1x16xi32>
      tpu.vector_store %arg10[%c0_19, %c0_20], %21 {strides = array<i32>} : memref<1x16xi32, #tpu.memory_space<vmem>>, vector<1x16xi32>,
    } else {
    }
    %c0_i32_13 = arith.constant 0 : i32
    %27 = arith.cmpi sgt, %arg1, %c0_i32_13 : i32
    %28 = arith.extui %27 : i1 to i32
    %c0_i32_14 = arith.constant 0 : i32
    %29 = arith.cmpi ne, %28, %c0_i32_14 : i32
    scf.if %29 {
      %c0_17 = arith.constant 0 : index
      %c0_18 = arith.constant 0 : index
      %33 = vector.load %arg9[%c0_17, %c0_18] : memref<1x16xf32, #tpu.memory_space<vmem>>, vector<1x16xf32>
      %34 = arith.cmpf ogt, %23, %33 : vector<1x16xf32>
      %c0_19 = arith.constant 0 : index
      %c0_20 = arith.constant 0 : index
      %35 = vector.load %arg9[%c0_19, %c0_20] : memref<1x16xf32, #tpu.memory_space<vmem>>, vector<1x16xf32>
      %36 = arith.select %34, %23, %35 : vector<1x16xi1>, vector<1x16xf32>
      %c0_21 = arith.constant 0 : index
      %c0_22 = arith.constant 0 : index
      %37 = vector.load %arg9[%c0_21, %c0_22] : memref<1x16xf32, #tpu.memory_space<vmem>>, vector<1x16xf32>
      tpu.vector_store %arg9[%c0_21, %c0_22], %36 {strides = array<i32>} : memref<1x16xf32, #tpu.memory_space<vmem>>, vector<1x16xf32>,
      %c0_23 = arith.constant 0 : index
      %c0_24 = arith.constant 0 : index
      %38 = vector.load %arg10[%c0_23, %c0_24] : memref<1x16xi32, #tpu.memory_space<vmem>>, vector<1x16xi32>
      %39 = arith.select %34, %21, %38 : vector<1x16xi1>, vector<1x16xi32>
      %c0_25 = arith.constant 0 : index
      %c0_26 = arith.constant 0 : index
      %40 = vector.load %arg10[%c0_25, %c0_26] : memref<1x16xi32, #tpu.memory_space<vmem>>, vector<1x16xi32>
      tpu.vector_store %arg10[%c0_25, %c0_26], %39 {strides = array<i32>} : memref<1x16xi32, #tpu.memory_space<vmem>>, vector<1x16xi32>,
    } else {
    }
    %c0_i32_15 = arith.constant 0 : i32
    %30 = arith.cmpi eq, %arg1, %c0_i32_15 : i32
    %31 = arith.extui %30 : i1 to i32
    %c0_i32_16 = arith.constant 0 : i32
    %32 = arith.cmpi ne, %31, %c0_i32_16 : i32
    scf.if %32 {
      %c0_17 = arith.constant 0 : index
      %c0_18 = arith.constant 0 : index
      %33 = vector.load %arg10[%c0_17, %c0_18] : memref<1x16xi32, #tpu.memory_space<vmem>>, vector<1x16xi32>
      %c0_19 = arith.constant 0 : index
      %c0_20 = arith.constant 0 : index
      %34 = vector.load %arg7[%c0_19, %c0_20] : memref<1x16xi32, #tpu.memory_space<vmem>>, vector<1x16xi32>
      tpu.vector_store %arg7[%c0_19, %c0_20], %33 {strides = array<i32>} : memref<1x16xi32, #tpu.memory_space<vmem>>, vector<1x16xi32>,
    } else {
    }
    return
  }
  func.func @transform_0(%arg0: i32, %arg1: i32) -> (i32, i32) {
    %c0_i32 = arith.constant 0 : i32
    %c0_i32_0 = arith.constant 0 : i32
    return %arg0, %c0_i32 : i32, i32
  }
  func.func @transform_1(%arg0: i32, %arg1: i32) -> (i32, i32) {
    %c0_i32 = arith.constant 0 : i32
    %c0_i32_0 = arith.constant 0 : i32
    %c0_i32_1 = arith.constant 0 : i32
    return %c0_i32, %c0_i32_0 : i32, i32
  }
  func.func @transform_2(%arg0: i32, %arg1: i32) -> (i32, i32) {
    %c0_i32 = arith.constant 0 : i32
    %c0_i32_0 = arith.constant 0 : i32
    return %c0_i32, %arg1 : i32, i32
  }
  func.func @transform_3(%arg0: i32, %arg1: i32) -> (i32, i32) {
    %c0_i32 = arith.constant 0 : i32
    %c0_i32_0 = arith.constant 0 : i32
    return %c0_i32, %arg1 : i32, i32
  }
  func.func @transform_4(%arg0: i32, %arg1: i32) -> (i32, i32) {
    %c0_i32 = arith.constant 0 : i32
    return %arg0, %arg1 : i32, i32
  }
  func.func @transform_5(%arg0: i32, %arg1: i32) -> (i32, i32) {
    %c0_i32 = arith.constant 0 : i32
    %c0_i32_0 = arith.constant 0 : i32
    return %arg0, %c0_i32 : i32, i32
  }
}

</mosaic_0001>

<bundles_post_ra>
// kernel: tpu_custom_call.1
= control target key start
LH: loop header
LB: loop body
LE: loop exit
PB: predicated region body
PF: predicated region fallthrough
CT: control target
= control target key end

     0   :  { %11 = vsyncpa [#allocation6], 0  ;;  %s1559_s0 = inlined_call_operand.vmem [shape: s32[16,1], index: 0, kind: input, shape index: {}]   ;;  %s1560_s1 = inlined_call_operand.hbm [shape: bf16[64,768], index: 1, kind: input, shape index: {}]   ;;  %s1561_s2 = inlined_call_operand.hbm [shape: bf16[768,128], index: 2, kind: input, shape index: {}]   ;;  %s1562_s3 = inlined_call_operand.vmem [shape: f32[1,128], index: 3, kind: input, shape index: {}]   ;;  %s1563_s4 = inlined_call_operand.hbm [shape: f32[16,128], index: 4, kind: output, shape index: {0}]   ;;  %s1564_s5 = inlined_call_operand.hbm [shape: s32[1,16], index: 5, kind: output, shape index: {1}]  }
   0x1   :  { %12 = vsyncpa [#allocation9], 0 }
   0x2   :  { %13 = vsyncpa [#allocation7], 0 }
   0x3   :  { %14 = vsyncpa [#allocation12], 0  ;;  %s1480_s18 = smov [#allocation5]  }
   0x4   :  { %s22_s19 = sshll.u32 %s1480_s18, 4  ;;  %s23_s19 = int_to_ptr.vmem [resolvable:$true] %s22_s19 }
   0x5   :  { %s1400_s20 = scalar_lea.vmem %s23_s19, 3072  ;;  %p1405_p1 = scmp.lt.s32.totalorder %s23_s19, %s23_s19 }
   0x6   :  { %p1401_p0 = scmp.ne.s32.totalorder %s23_s19, %s1400_s20  ;;  %p1406_p2 = scmp.lt.s32.totalorder %s1400_s20, %s1400_s20 }
   0x8   :  { %p1407_p3 = por %p1406_p2, %p1405_p1 }
   0xa   :  { %p1408_p4 = pnand %p1407_p3, %p1401_p0 }
   0xc   :  { %1411 = shalt.err (!%p1408_p4)
}
   0xd   :  { %s1481_s21 = smov 384   ;;  %s1482_s22 = smov 24  }
   0xe   :  { %28 = dma.hbm_to_vmem [thread:$0]  %s1560_s1, 3072, %s23_s19, [#allocation6], %s1481_s21, %s1481_s21, %s1482_s22  }
   0xf   :  { %s1483_s25 = smov [#allocation8]  }
  0x10   :  { %s34_s26 = sshll.u32 %s1483_s25, 4  ;;  %s35_s26 = int_to_ptr.vmem [resolvable:$true] %s34_s26 }
  0x11   :  { %s1420_s27 = scalar_lea.vmem %s35_s26, 6144  ;;  %p1425_p6 = scmp.lt.s32.totalorder %s35_s26, %s35_s26 }
  0x12   :  { %p1421_p5 = scmp.ne.s32.totalorder %s35_s26, %s1420_s27  ;;  %p1426_p7 = scmp.lt.s32.totalorder %s1420_s27, %s1420_s27 }
  0x14   :  { %p1427_p8 = por %p1426_p7, %p1425_p6 }
  0x16   :  { %p1428_p9 = pnand %p1427_p8, %p1421_p5 }
  0x18   :  { %1431 = shalt.err (!%p1428_p9)
}
  0x19   :  { %s1484_s28 = smov 64   ;;  %s1485_s29 = smov 4  }
  0x1a   :  { %40 = dma.hbm_to_vmem [thread:$0]  %s1561_s2, 6144, %s35_s26, [#allocation9], %s1484_s28, %s1484_s28, %s1485_s29  }
  0x1b   :  { %1472 = dma.done.wait [#allocation6], 3072  }
  0x1c   :  { %1473 = vsyncadd [#allocation6], 4294964224 }
  0x1d   :  { %1474 = dma.done.wait [#allocation9], 6144  }
  0x1e   :  { %1475 = vsyncadd [#allocation9], 4294961152  ;;  %v1486_v0 = vmov 0   ;;  %v54_v1 = vld [vmem:[%s1559_s0] sm:$0xff]  ;;  %v55_v2 = vld [vmem:[%s1559_s0 + $0x8] sm:$0xff]  ;;  %v56_v21 = vlaneseq  ;;  %v1487_v25 = vmov 0.0  }
  0x1f   :  { %1307 = vset.pattern.permute.xlu0 %v1486_v0  ;;  %251 = vmatprep.mubr.bf16.mxu0 %v1486_v0  ;;  %v1308_v3 = vld [vmem:[#allocation5 + $0x94] ss:$24 sps:$4 sm:$0xff]   ;;  %v1310_v4 = vld [vmem:[#allocation5 + $0x90] ss:$24 sps:$4 sm:$0xff]   ;;  %v1314_v7 = vld [vmem:[#allocation5 + $0x64] ss:$24 sps:$4 sm:$0xff]  }
  0x20   :  { %294 = vmatprep.mubr.bf16.mxu1 %v1486_v0  ;;  %59 = vperm.xlu0 %1307, %v54_v1   ;;  %v1311_v5 = vld [vmem:[#allocation5 + $0x9c] ss:$24 sps:$4 sm:$0xff]   ;;  %v1313_v6 = vld [vmem:[#allocation5 + $0x98] ss:$24 sps:$4 sm:$0xff]   ;;  %v1317_v9 = vld [vmem:[#allocation5 + $0x6c] ss:$24 sps:$4 sm:$0xff]  }
  0x21   :  { %227 = vmatprep.subr.bf16.mxu0 %v1308_v3  ;;  %270 = vmatprep.subr.bf16.mxu1 %v1311_v5  ;;  %v1316_v8 = vld [vmem:[#allocation5 + $0x60] ss:$24 sps:$4 sm:$0xff]   ;;  %v1320_v11 = vld [vmem:[#allocation5 + $0x34] ss:$24 sps:$4 sm:$0xff]   ;;  %v1322_v12 = vld [vmem:[#allocation5 + $0x30] ss:$24 sps:$4 sm:$0xff]  }
  0x22   :  { %228 = vmatpush1.bf16.msra.mxu0 %v1310_v4  ;;  %271 = vmatpush1.bf16.msra.mxu1 %v1313_v6  ;;  %v1319_v10 = vld [vmem:[#allocation5 + $0x68] ss:$24 sps:$4 sm:$0xff]   ;;  %v1323_v13 = vld [vmem:[#allocation5 + $0x3c] ss:$24 sps:$4 sm:$0xff]   ;;  %v1325_v14 = vld [vmem:[#allocation5 + $0x38] ss:$24 sps:$4 sm:$0xff]  }
  0x23   :  { %229 = vmatprep.subr.bf16.mxu0 %v1314_v7  ;;  %272 = vmatprep.subr.bf16.mxu1 %v1317_v9  ;;  %v1326_v15 = vld [vmem:[#allocation5 + $0x4] ss:$24 sps:$4 sm:$0xff]   ;;  %v1328_v17 = vld [vmem:[#allocation5] ss:$24 sps:$4 sm:$0xff]   ;;  %v1535_v22 = vand.u32 127, %v56_v21  ;;  %vm215_vm2 = vcmask 523264  }
  0x24   :  { %62 = vperm.xlu0 %1307, %v55_v2   ;;  %v1329_v16 = vld [vmem:[#allocation5 + $0xc] ss:$24 sps:$4 sm:$0xff]   ;;  %v1331_v18 = vld [vmem:[#allocation5 + $0x8] ss:$24 sps:$4 sm:$0xff]   ;;  %v1344_v20 = vld [vmem:[#allocation8 + $0x78] sm:$0xff]   ;;  %vm997_vm4 = vcmask 130112  }
  0x25   :  { %v1334_v19 = vld [vmem:[#allocation5 + $0xa4] ss:$24 sps:$4 sm:$0xff]   ;;  %v1332_v28 = vld [vmem:[#allocation5 + $0xa0] ss:$24 sps:$4 sm:$0xff]   ;;  %v1337_v30 = vld [vmem:[#allocation5 + $0x74] ss:$24 sps:$4 sm:$0xff]  }
  0x26   :  { %230 = vmatpush1.bf16.msra.mxu0 %v1316_v8  ;;  %273 = vmatpush1.bf16.msra.mxu1 %v1319_v10  ;;  %v1345_v31 = vld [vmem:[#allocation8 + $0x38] sm:$0xff]   ;;  %v1348_v32 = vld [vmem:[#allocation8 + $0x70] sm:$0xff]   ;;  %v1352_v36 = vld [vmem:[#allocation8 + $0x68] sm:$0xff]   ;;  %vm1000_vm5 = vcmask 122880  }
  0x27   :  { %231 = vmatprep.subr.bf16.mxu0 %v1320_v11  ;;  %274 = vmatprep.subr.bf16.mxu1 %v1323_v13  ;;  %v1335_v33 = vld [vmem:[#allocation5 + $0x70] ss:$24 sps:$4 sm:$0xff]   ;;  %v1340_v34 = vld [vmem:[#allocation5 + $0x44] ss:$24 sps:$4 sm:$0xff]   ;;  %v1338_v37 = vld [vmem:[#allocation5 + $0x40] ss:$24 sps:$4 sm:$0xff]  }
  0x28   :  { %v1349_v35 = vld [vmem:[#allocation8 + $0x30] sm:$0xff]   ;;  %v1353_v39 = vld [vmem:[#allocation8 + $0x28] sm:$0xff]   ;;  %v1356_v40 = vld [vmem:[#allocation8 + $0x60] sm:$0xff]  }
  0x29   :  { %v1343_v38 = vld [vmem:[#allocation5 + $0x14] ss:$24 sps:$4 sm:$0xff]   ;;  %v1341_v41 = vld [vmem:[#allocation5 + $0x10] ss:$24 sps:$4 sm:$0xff]   ;;  %v1346_v42 = vld [vmem:[#allocation8 + $0xf8] sm:$0xff]  }
  0x2a   :  { %232 = vmatpush1.bf16.msra.mxu0 %v1322_v12  ;;  %275 = vmatpush1.bf16.msra.mxu1 %v1325_v14  ;;  %v1357_v43 = vld [vmem:[#allocation8 + $0x20] sm:$0xff]   ;;  %v1360_v44 = vld [vmem:[#allocation8 + $0x58] sm:$0xff]   ;;  %v1350_v46 = vld [vmem:[#allocation8 + $0xf0] sm:$0xff]  }
  0x2b   :  { %233 = vmatprep.subr.bf16.mxu0 %v1326_v15  ;;  %276 = vmatprep.subr.bf16.mxu1 %v1329_v16  ;;  %v1347_v45 = vld [vmem:[#allocation8 + $0xb8] sm:$0xff]   ;;  %v1364_v48 = vld [vmem:[#allocation8 + $0x50] sm:$0xff]   ;;  %v1354_v50 = vld [vmem:[#allocation8 + $0xe8] sm:$0xff]  }
  0x2c   :  { %v1361_v47 = vld [vmem:[#allocation8 + $0x18] sm:$0xff]   ;;  %v1351_v49 = vld [vmem:[#allocation8 + $0xb0] sm:$0xff]   ;;  %v1355_v52 = vld [vmem:[#allocation8 + $0xa8] sm:$0xff]  }
  0x2d   :  { %v1365_v51 = vld [vmem:[#allocation8 + $0x10] sm:$0xff]   ;;  %v1358_v53 = vld [vmem:[#allocation8 + $0xe0] sm:$0xff]   ;;  %v1362_v55 = vld [vmem:[#allocation8 + $0xd8] sm:$0xff]  }
  0x2e   :  { %234 = vmatpush1.bf16.msra.mxu0 %v1328_v17  ;;  %277 = vmatpush1.bf16.msra.mxu1 %v1331_v18  ;;  %v1359_v54 = vld [vmem:[#allocation8 + $0xa0] sm:$0xff]   ;;  %v1363_v56 = vld [vmem:[#allocation8 + $0x98] sm:$0xff]   ;;  %v1366_v57 = vld [vmem:[#allocation8 + $0xd0] sm:$0xff]  }
  0x2f   :  { %313 = vmatprep.subr.bf16.mxu0 %v1334_v19  ;;  %1229 = vmatprep.subr.bf16.mxu1 %v1344_v20  ;;  %v1367_v58 = vld [vmem:[#allocation8 + $0x90] sm:$0xff]   ;;  %v1368_v59 = vld [vmem:[#allocation8 + $0x48] sm:$0xff]   ;;  %v1372_v63 = vld [vmem:[#allocation8 + $0x40] sm:$0xff]  }
  0x30   :  { %v1369_v60 = vld [vmem:[#allocation8 + $0x8] sm:$0xff]   ;;  %v1374_v1 = vld [vmem:[#allocation8 + $0xc0] sm:$0xff]   ;;  %v1376_v3 = vld [vmem:[#allocation8 + $0x178] sm:$0xff]  }
  0x31   :  { %v1370_v61 = vld [vmem:[#allocation8 + $0xc8] sm:$0xff]   ;;  %v1375_v2 = vld [vmem:[#allocation8 + $0x80] sm:$0xff]   ;;  %v1377_v14 = vld [vmem:[#allocation8 + $0x138] sm:$0xff]  }
  0x32   :  { %v1371_v62 = vld [vmem:[#allocation8 + $0x88] sm:$0xff]   ;;  %v1378_v17 = vld [vmem:[#allocation8 + $0x170] sm:$0xff]  }
  0x33   :  { %v1379_v18 = vld [vmem:[#allocation8 + $0x130] sm:$0xff]   ;;  %v1380_v19 = vld [vmem:[#allocation8 + $0x168] sm:$0xff]  }
  0x34   :  { %v1381_v20 = vld [vmem:[#allocation8 + $0x128] sm:$0xff]  }
  0x9b   :  { %v60_v23 = vpop.permute.xlu0 %59 }
  0x9c   :  { %vm64_vm0 = vcmp.eq.s32.totalorder %v60_v23, %v1535_v22 }
  0x9d   :  { %v1125_v26 = vsel %vm64_vm0, 1.0, %v1487_v25 }
  0x9f   :  { %v63_v24 = vpop.permute.xlu0 %62 }
  0xa0   :  { %vm65_vm1 = vcmp.eq.s32.totalorder %v63_v24, %v1535_v22  ;;  %v1382_v24 = vld [vmem:[#allocation8 + $0x160] sm:$0xff]  }
  0xa1   :  { %v1126_v27 = vsel %vm65_vm1, 1.0, %v1487_v25 }
  0xa2   :  { %v70_v29 = vpack.c.bf16 %v1126_v27, %v1125_v26  ;;  %v1383_v26 = vld [vmem:[#allocation8 + $0x120] sm:$0xff]  }
  0xa4   :  { %1151 = vmatmul.mubr.msk.bf16.vlgmr.msra.gmra.mxu0 %vm215_vm2, %v70_v29  ;;  %1152 = vmatmul.mubr.msk.bf16.vlgmr.msra.gmra.mxu1 %vm215_vm2, %v70_v29 }
  0xa5   :  { %314 = vmatpush1.bf16.msra.mxu0 %v1332_v28  ;;  %337 = vmatprep.mubr.bf16.mxu0 %v1486_v0  ;;  %v1373_v0 = vld [vmem:[#allocation8] sm:$0xff]   ;;  %v1384_v28 = vld [vmem:[#allocation8 + $0x158] sm:$0xff]  }
  0xa6   :  { %315 = vmatprep.subr.bf16.mxu0 %v1337_v30  ;;  %1230 = vmatpush3.bf16.msra.mxu1 %v1345_v31  ;;  %v1385_v31 = vld [vmem:[#allocation8 + $0x118] sm:$0xff]  }
  0xa7   :  { %1231 = vmatprep.subr.bf16.mxu1 %v1348_v32  ;;  %v1386_v32 = vld [vmem:[#allocation8 + $0x150] sm:$0xff]  }
  0xa9   :  { %316 = vmatpush1.bf16.msra.mxu0 %v1335_v33  ;;  %v1387_v33 = vld [vmem:[#allocation8 + $0x110] sm:$0xff]  }
  0xaa   :  { %317 = vmatprep.subr.bf16.mxu0 %v1340_v34  ;;  %1232 = vmatpush3.bf16.msra.mxu1 %v1349_v35  ;;  %v1388_v34 = vld [vmem:[#allocation8 + $0x148] sm:$0xff]  }
  0xab   :  { %1233 = vmatprep.subr.bf16.mxu1 %v1352_v36  ;;  %v1389_v35 = vld [vmem:[#allocation8 + $0x108] sm:$0xff]   ;;  %v1390_v36 = vld [vmem:[#allocation8 + $0x140] sm:$0xff]  }
  0xad   :  { %318 = vmatpush1.bf16.msra.mxu0 %v1338_v37  ;;  %v1391_v37 = vld [vmem:[#allocation8 + $0x100] sm:$0xff]  }
  0xae   :  { %319 = vmatprep.subr.bf16.mxu0 %v1343_v38  ;;  %1234 = vmatpush3.bf16.msra.mxu1 %v1353_v39 }
  0xaf   :  { %1235 = vmatprep.subr.bf16.mxu1 %v1356_v40 }
  0xb1   :  { %320 = vmatpush1.bf16.msra.mxu0 %v1341_v41 }
  0xb2   :  { %1251 = vmatprep.subr.bf16.mxu0 %v1346_v42  ;;  %1236 = vmatpush3.bf16.msra.mxu1 %v1357_v43 }
  0xb3   :  { %1237 = vmatprep.subr.bf16.mxu1 %v1360_v44 }
  0xb4   :  { %1153 = vmatmul.mubr.msk.bf16.vlgmr.msra.gmra.mxu0 %vm215_vm2, %v70_v29 }
  0xb5   :  { %1252 = vmatpush3.bf16.msra.mxu0 %v1347_v45  ;;  %v1160_v45 = vld [vmem:[%s1562_s3] ss:$0 sm:$0xff]  ;;  %s1488_s3 = smov [#allocation10]  }
  0xb6   :  { %1253 = vmatprep.subr.bf16.mxu0 %v1350_v46  ;;  %1238 = vmatpush3.bf16.msra.mxu1 %v1361_v47  ;;  %s1098_s10 = sshll.u32 %s1488_s3, 4  ;;  %s1099_s10 = int_to_ptr.vmem [resolvable:$true] %s1098_s10 }
  0xb7   :  { %1239 = vmatprep.subr.bf16.mxu1 %v1364_v48  ;;  %s1432_s11 = scalar_lea.vmem %s1099_s10, 256  ;;  %p1437_p11 = scmp.lt.s32.totalorder %s1099_s10, %s1099_s10 }
  0xb8   :  { %p1433_p10 = scmp.ne.s32.totalorder %s1099_s10, %s1432_s11  ;;  %p1438_p12 = scmp.lt.s32.totalorder %s1432_s11, %s1432_s11 }
  0xb9   :  { %1254 = vmatpush3.bf16.msra.mxu0 %v1351_v49 }
  0xba   :  { %1255 = vmatprep.subr.bf16.mxu0 %v1354_v50  ;;  %1240 = vmatpush3.bf16.msra.mxu1 %v1365_v51  ;;  %p1439_p13 = por %p1438_p12, %p1437_p11 }
  0xbb   :  { %1241 = vmatprep.subr.bf16.mxu1 %v1368_v59 }
  0xbc   :  { %p1440_p0 = pnand %p1439_p13, %p1433_p10 }
  0xbd   :  { %1256 = vmatpush3.bf16.msra.mxu0 %v1355_v52 }
  0xbe   :  { %1257 = vmatprep.subr.bf16.mxu0 %v1358_v53  ;;  %1242 = vmatpush3.bf16.msra.mxu1 %v1369_v60 }
  0xbf   :  { %1243 = vmatprep.subr.bf16.mxu1 %v1372_v63 }
  0xc1   :  { %1258 = vmatpush3.bf16.msra.mxu0 %v1359_v54 }
  0xc2   :  { %1259 = vmatprep.subr.bf16.mxu0 %v1362_v55  ;;  %1244 = vmatpush3.bf16.msra.mxu1 %v1373_v0  ;;  %v989_v0 = vshrl.u32 %v56_v21, 7 }
  0xc3   :  { %1273 = vmatprep.subr.bf16.mxu1 %v1376_v3 }
  0xc4   :  { %v990_v3 = vsub.s32 %v1535_v22, %v989_v0 }
  0xc5   :  { %1260 = vmatpush3.bf16.msra.mxu0 %v1363_v56 }
  0xc6   :  { %1261 = vmatprep.subr.bf16.mxu0 %v1366_v57 }
  0xc9   :  { %1262 = vmatpush3.bf16.msra.mxu0 %v1367_v58 }
  0xca   :  { %1263 = vmatprep.subr.bf16.mxu0 %v1370_v61 }
  0xcd   :  { %1264 = vmatpush3.bf16.msra.mxu0 %v1371_v62 }
  0xce   :  { %1265 = vmatprep.subr.bf16.mxu0 %v1374_v1  ;;  %v992_v1 = vadd.s32 4294967288, %v1535_v22 }
  0xd1   :  { %1266 = vmatpush3.bf16.msra.mxu0 %v1375_v2 }
 0x164   :  { %v253_v4 = vpop.f32.mrf.mxu0  ;;  %v296_v5 = vpop.f32.mrf.mxu1 }
 0x166   :  { %v255_v6 = vpop.f32.mrf.mxu0  ;;  %v298_v7 = vpop.f32.mrf.mxu1 }
 0x168   :  { %v257_v8 = vpop.f32.mrf.mxu0  ;;  %v300_v9 = vpop.f32.mrf.mxu1 }
 0x169   :  { %v1223_v15 = vpack.c.bf16 %v257_v8, %v253_v4  ;;  %v1225_v16 = vpack.c.bf16 %v300_v9, %v296_v5  ;;  %v995_v4 = vsub.s32 %v992_v1, %v989_v0 }
 0x16a   :  { %v259_v10 = vpop.f32.mrf.mxu0  ;;  %v302_v11 = vpop.f32.mrf.mxu1 }
 0x16b   :  { %v1224_v12 = vpack.c.bf16 %v259_v10, %v255_v6  ;;  %v1226_v13 = vpack.c.bf16 %v302_v11, %v298_v7 }
 0x16d   :  { %849 = vmatprep.mubr.bf16.mxu1 %v1224_v12  ;;  %890 = vmatprep.mubr.bf16.mxu0 %v1226_v13 }
 0x16e   :  { %850 = vmatmul.mubr.bf16.vlgmr.msra.gmra.mxu1 %v1223_v15  ;;  %891 = vmatmul.mubr.bf16.vlgmr.msra.gmra.mxu0 %v1225_v16 }
 0x16f   :  { %1274 = vmatpush3.bf16.msra.mxu1 %v1377_v14 }
 0x170   :  { %1275 = vmatprep.subr.bf16.mxu1 %v1378_v17 }
 0x173   :  { %1276 = vmatpush3.bf16.msra.mxu1 %v1379_v18 }
 0x174   :  { %v339_v23 = vpop.f32.mrf.mxu0  ;;  %1277 = vmatprep.subr.bf16.mxu1 %v1380_v19 }
 0x176   :  { %v341_v25 = vpop.f32.mrf.mxu0 }
 0x177   :  { %1278 = vmatpush3.bf16.msra.mxu1 %v1381_v20 }
 0x178   :  { %v343_v27 = vpop.f32.mrf.mxu0  ;;  %1279 = vmatprep.subr.bf16.mxu1 %v1382_v24 }
 0x179   :  { %v1227_v38 = vpack.c.bf16 %v343_v27, %v339_v23 }
 0x17a   :  { %v345_v29 = vpop.f32.mrf.mxu0 }
 0x17b   :  { %v1228_v30 = vpack.c.bf16 %v345_v29, %v341_v25  ;;  %1280 = vmatpush3.bf16.msra.mxu1 %v1383_v26 }
 0x17c   :  { %1281 = vmatprep.subr.bf16.mxu1 %v1384_v28 }
 0x17d   :  { %931 = vmatprep.mubr.bf16.mxu1 %v1228_v30 }
 0x17f   :  { %1282 = vmatpush3.bf16.msra.mxu1 %v1385_v31 }
 0x180   :  { %1283 = vmatprep.subr.bf16.mxu1 %v1386_v32 }
 0x183   :  { %1284 = vmatpush3.bf16.msra.mxu1 %v1387_v33 }
 0x184   :  { %1285 = vmatprep.subr.bf16.mxu1 %v1388_v34 }
 0x187   :  { %1286 = vmatpush3.bf16.msra.mxu1 %v1389_v35 }
 0x188   :  { %1287 = vmatprep.subr.bf16.mxu1 %v1390_v36 }
 0x18b   :  { %1288 = vmatpush3.bf16.msra.mxu1 %v1391_v37 }
 0x18e   :  { %932 = vmatmul.mubr.bf16.vlgmr.msra.gmra.mxu1 %v1227_v38 }
 0x22e   :  { %v1245_v39 = vpop.f32.mrf.mxu1  ;;  %v1267_v41 = vpop.f32.mrf.mxu0 }
 0x230   :  { %v1246_v40 = vpop.f32.mrf.mxu1  ;;  %v1268_v43 = vpop.f32.mrf.mxu0 }
 0x231   :  { %v1247_v44 = vadd.f32 %v1246_v40, %v1245_v39  ;;  %v1269_v51 = vadd.f32 %v1268_v43, %v1267_v41 }
 0x232   :  { %v1248_v42 = vpop.f32.mrf.mxu1  ;;  %v1270_v47 = vpop.f32.mrf.mxu0 }
 0x233   :  { %v852_v48 = vadd.f32 %v1247_v44, %v1160_v45 }
 0x234   :  { %v1249_v46 = vpop.f32.mrf.mxu1  ;;  %v1271_v52 = vpop.f32.mrf.mxu0 }
 0x235   :  { %v1250_v49 = vadd.f32 %v1249_v46, %v1248_v42  ;;  %v893_v54 = vadd.f32 %v1269_v51, %v852_v48  ;;  %v1272_v58 = vadd.f32 %v1271_v52, %v1270_v47 }
 0x237   :  { %v855_v55 = vadd.f32 %v1250_v49, %v1160_v45 }
 0x239   :  { %v896_v61 = vadd.f32 %v1272_v58, %v855_v55 }
 0x24e   :  { %v1289_v50 = vpop.f32.mrf.mxu1 }
 0x250   :  { %v1290_v53 = vpop.f32.mrf.mxu1 }
 0x251   :  { %v1291_v56 = vadd.f32 %v1290_v53, %v1289_v50 }
 0x252   :  { %v1292_v57 = vpop.f32.mrf.mxu1 }
 0x253   :  { %v934_v59 = vadd.f32 %v1291_v56, %v893_v54 }
 0x254   :  { %v1293_v60 = vpop.f32.mrf.mxu1 }
 0x255   :  { %940 = vst [vmem:[#allocation10] sm:$0xff] %v934_v59  ;;  %v1294_v62 = vadd.f32 %v1293_v60, %v1292_v57  ;;  %947 = vmax.xlane.f32.xlu1 %v934_v59 }
 0x257   :  { %v937_v63 = vadd.f32 %v1294_v62, %v896_v61 }
 0x259   :  { %941 = vst [vmem:[#allocation10 + $0x8] sm:$0xff] %v937_v63  ;;  %949 = vmax.xlane.f32.xlu1 %v937_v63 }
 0x2de   :  { %v948_v2 = vpop.xlane.xlu1 %947 }
 0x2df   :  { %vm951_vm3 = vcmp.eq.f32.partialorder %v934_v59, %v948_v2 }
 0x2e0   :  { %v953_v5 = vsel %vm951_vm3, %v1535_v22, 2147483647 }
 0x2e1   :  { %v956_v6 = vshra.s32 %v953_v5, 16  ;;  %v955_v11 = vand.u32 65535, %v953_v5 }
 0x2e2   :  { %v950_v7 = vpop.xlane.xlu1 %949 }
 0x2e3   :  { %vm952_vm6 = vcmp.eq.f32.partialorder %v937_v63, %v950_v7  ;;  %v958_v8 = vcvt.s32.f32 %v956_v6  ;;  %v957_v13 = vcvt.s32.f32 %v955_v11 }
 0x2e4   :  { %v954_v9 = vsel %vm952_vm6, %v1535_v22, 2147483647 }
 0x2e5   :  { %959 = vmin.xlane.f32.xlu0 %v958_v8  ;;  %v970_v10 = vshra.s32 %v954_v9, 16  ;;  %v969_v14 = vand.u32 65535, %v954_v9 }
 0x2e7   :  { %v972_v21 = vcvt.s32.f32 %v970_v10  ;;  %v971_v17 = vcvt.s32.f32 %v969_v14 }
 0x2e9   :  { %973 = vmin.xlane.f32.xlu1 %v972_v21 }
 0x36e   :  { %v960_v12 = vpop.xlane.xlu0 %959 }
 0x36f   :  { %vm961_vm7 = vcmp.eq.f32.partialorder %v958_v8, %v960_v12 }
 0x370   :  { %v962_v15 = vsel %vm961_vm7, %v957_v13, inf }
 0x371   :  { %963 = vmin.xlane.f32.xlu1 %v962_v15 }
 0x372   :  { %v974_v16 = vpop.xlane.xlu1 %973 }
 0x373   :  { %vm975_vm8 = vcmp.eq.f32.partialorder %v972_v21, %v974_v16 }
 0x374   :  { %v976_v18 = vsel %vm975_vm8, %v971_v17, inf }
 0x375   :  { %977 = vmin.xlane.f32.xlu1 %v976_v18 }
 0x376   :  { %1443 = shalt.err (!%p1440_p0)
}
 0x377   :  { %s1489_s12 = smov 128   ;;  %s1490_s13 = smov 8   ;;  %v966_v22 = vcvt.f32.s32 %v960_v12  ;;  %v980_v20 = vcvt.f32.s32 %v974_v16 }
 0x378   :  { %1104 = dma.vmem_to_hbm [thread:$0]  %s1099_s10, 256, %s1563_s4, [#allocation7], %s1489_s12, %s1489_s12, %s1490_s13  }
 0x379   :  { %v967_v24 = vshll.u32 %v966_v22, 16  ;;  %v981_v26 = vshll.u32 %v980_v20, 16  ;;  %s1491_s16 = smov [#allocation11]  }
 0x37a   :  { %s1111_s17 = sshll.u32 %s1491_s16, 4  ;;  %s1112_s17 = int_to_ptr.vmem [resolvable:$true] %s1111_s17 }
 0x37b   :  { %s1452_s4 = scalar_lea.vmem %s1112_s17, 16  ;;  %s1456_s18 = scalar_lea.vmem %s1112_s17, 32 }
 0x37c   :  { %p1453_p1 = scmp.ne.s32.totalorder %s1112_s17, %s1452_s4  ;;  %p1457_p2 = scmp.lt.s32.totalorder %s1112_s17, %s1112_s17 }
 0x37d   :  { %p1458_p3 = scmp.lt.s32.totalorder %s1456_s18, %s1452_s4 }
 0x37f   :  { %p1459_p4 = por %p1458_p3, %p1457_p2 }
 0x381   :  { %p1460_p5 = pnand %p1459_p4, %p1453_p1 }
 0x3fa   :  { %v964_v19 = vpop.xlane.xlu1 %963 }
 0x3fb   :  { %v965_v23 = vcvt.f32.s32 %v964_v19 }
 0x3fd   :  { %v968_v27 = vadd.s32 %v967_v24, %v965_v23 }
 0x3fe   :  { %v978_v25 = vpop.xlane.xlu1 %977 }
 0x3ff   :  { %v979_v28 = vcvt.f32.s32 %v978_v25  ;;  %v1005_v30 = vrot.slane %v968_v27, %v990_v3 }
 0x401   :  { %v982_v29 = vadd.s32 %v981_v26, %v979_v28 }
 0x403   :  { %v1009_v31 = vrot.slane %v982_v29, %v995_v4 }
 0x405   :  { %v1010_v32 = vsel %vm997_vm4, %v1009_v31, %v1005_v30 }
 0x406   :  { %1011 = vst.msk [vmem:[#allocation4] sm:$0x1] %vm1000_vm5, %v1010_v32 }
 0x40d   :  { %v1090_v33 = vld [vmem:[#allocation4] sm:$0x1] }
 0x40e   :  { %1092 = vst.msk [vmem:[#allocation11] sm:$0x1] %vm1000_vm5, %v1090_v33 }
 0x40f   :  { %1463 = shalt.err (!%p1460_p5)
}
 0x410   :  { %1114 = dma.vmem_to_hbm [thread:$0]  %s1112_s17, 16, %s1564_s5, [#allocation12]  }
 0x411   :  { %1476 = dma.done.wait [#allocation7], 256  }
 0x412   :  { %1477 = vsyncadd [#allocation7], 4294967040 }
 0x413   :  { %1478 = dma.done.wait [#allocation12], 16  }
 0x414   :  { %1479 = vsyncadd [#allocation12], 4294967280 }
 0x415   :  { %1121 = vsyncpa [#allocation6], 1 }
 0x416   :  { %1122 = vsyncpa [#allocation9], 1 }
 0x417   :  { %1123 = vsyncpa [#allocation7], 1 }
 0x418   :  { %1124 = vsyncpa [#allocation12], 1 }

// kernel: tpu_custom_call.1
= control target key start
LH: loop header
LB: loop body
LE: loop exit
PB: predicated region body
PF: predicated region fallthrough
CT: control target
= control target key end

     0   :  { %11 = vsyncpa [#allocation6], 0  ;;  %s1559_s0 = inlined_call_operand.vmem [shape: s32[16,1], index: 0, kind: input, shape index: {}]   ;;  %s1560_s1 = inlined_call_operand.hbm [shape: bf16[64,768], index: 1, kind: input, shape index: {}]   ;;  %s1561_s2 = inlined_call_operand.hbm [shape: bf16[768,128], index: 2, kind: input, shape index: {}]   ;;  %s1562_s3 = inlined_call_operand.vmem [shape: f32[1,128], index: 3, kind: input, shape index: {}]   ;;  %s1563_s4 = inlined_call_operand.hbm [shape: f32[16,128], index: 4, kind: output, shape index: {0}]   ;;  %s1564_s5 = inlined_call_operand.hbm [shape: s32[1,16], index: 5, kind: output, shape index: {1}]  }
   0x1   :  { %12 = vsyncpa [#allocation9], 0 }
   0x2   :  { %13 = vsyncpa [#allocation7], 0 }
   0x3   :  { %14 = vsyncpa [#allocation12], 0  ;;  %s1480_s18 = smov [#allocation5]  }
   0x4   :  { %s22_s19 = sshll.u32 %s1480_s18, 4  ;;  %s23_s19 = int_to_ptr.vmem [resolvable:$true] %s22_s19 }
   0x5   :  { %s1400_s20 = scalar_lea.vmem %s23_s19, 3072  ;;  %p1405_p1 = scmp.lt.s32.totalorder %s23_s19, %s23_s19 }
   0x6   :  { %p1401_p0 = scmp.ne.s32.totalorder %s23_s19, %s1400_s20  ;;  %p1406_p2 = scmp.lt.s32.totalorder %s1400_s20, %s1400_s20 }
   0x8   :  { %p1407_p3 = por %p1406_p2, %p1405_p1 }
   0xa   :  { %p1408_p4 = pnand %p1407_p3, %p1401_p0 }
   0xc   :  { %1411 = shalt.err (!%p1408_p4)
}
   0xd   :  { %s1481_s21 = smov 384   ;;  %s1482_s22 = smov 24  }
   0xe   :  { %28 = dma.hbm_to_vmem [thread:$0]  %s1560_s1, 3072, %s23_s19, [#allocation6], %s1481_s21, %s1481_s21, %s1482_s22  }
   0xf   :  { %s1483_s25 = smov [#allocation8]  }
  0x10   :  { %s34_s26 = sshll.u32 %s1483_s25, 4  ;;  %s35_s26 = int_to_ptr.vmem [resolvable:$true] %s34_s26 }
  0x11   :  { %s1420_s27 = scalar_lea.vmem %s35_s26, 6144  ;;  %p1425_p6 = scmp.lt.s32.totalorder %s35_s26, %s35_s26 }
  0x12   :  { %p1421_p5 = scmp.ne.s32.totalorder %s35_s26, %s1420_s27  ;;  %p1426_p7 = scmp.lt.s32.totalorder %s1420_s27, %s1420_s27 }
  0x14   :  { %p1427_p8 = por %p1426_p7, %p1425_p6 }
  0x16   :  { %p1428_p9 = pnand %p1427_p8, %p1421_p5 }
  0x18   :  { %1431 = shalt.err (!%p1428_p9)
}
  0x19   :  { %s1484_s28 = smov 64   ;;  %s1485_s29 = smov 4  }
  0x1a   :  { %40 = dma.hbm_to_vmem [thread:$0]  %s1561_s2, 6144, %s35_s26, [#allocation9], %s1484_s28, %s1484_s28, %s1485_s29  }
  0x1b   :  { %1472 = dma.done.wait [#allocation6], 3072  }
  0x1c   :  { %1473 = vsyncadd [#allocation6], 4294964224 }
  0x1d   :  { %1474 = dma.done.wait [#allocation9], 6144  }
  0x1e   :  { %1475 = vsyncadd [#allocation9], 4294961152  ;;  %v1486_v0 = vmov 0   ;;  %v54_v1 = vld [vmem:[%s1559_s0] sm:$0xff]  ;;  %v55_v2 = vld [vmem:[%s1559_s0 + $0x8] sm:$0xff]  ;;  %v56_v21 = vlaneseq  ;;  %v1487_v25 = vmov 0.0  }
  0x1f   :  { %1307 = vset.pattern.permute.xlu0 %v1486_v0  ;;  %251 = vmatprep.mubr.bf16.mxu0 %v1486_v0  ;;  %v1308_v3 = vld [vmem:[#allocation5 + $0x94] ss:$24 sps:$4 sm:$0xff]   ;;  %v1310_v4 = vld [vmem:[#allocation5 + $0x90] ss:$24 sps:$4 sm:$0xff]   ;;  %v1314_v7 = vld [vmem:[#allocation5 + $0x64] ss:$24 sps:$4 sm:$0xff]  }
  0x20   :  { %294 = vmatprep.mubr.bf16.mxu1 %v1486_v0  ;;  %59 = vperm.xlu0 %1307, %v54_v1   ;;  %v1311_v5 = vld [vmem:[#allocation5 + $0x9c] ss:$24 sps:$4 sm:$0xff]   ;;  %v1313_v6 = vld [vmem:[#allocation5 + $0x98] ss:$24 sps:$4 sm:$0xff]   ;;  %v1317_v9 = vld [vmem:[#allocation5 + $0x6c] ss:$24 sps:$4 sm:$0xff]  }
  0x21   :  { %227 = vmatprep.subr.bf16.mxu0 %v1308_v3  ;;  %270 = vmatprep.subr.bf16.mxu1 %v1311_v5  ;;  %v1316_v8 = vld [vmem:[#allocation5 + $0x60] ss:$24 sps:$4 sm:$0xff]   ;;  %v1320_v11 = vld [vmem:[#allocation5 + $0x34] ss:$24 sps:$4 sm:$0xff]   ;;  %v1322_v12 = vld [vmem:[#allocation5 + $0x30] ss:$24 sps:$4 sm:$0xff]  }
  0x22   :  { %228 = vmatpush1.bf16.msra.mxu0 %v1310_v4  ;;  %271 = vmatpush1.bf16.msra.mxu1 %v1313_v6  ;;  %v1319_v10 = vld [vmem:[#allocation5 + $0x68] ss:$24 sps:$4 sm:$0xff]   ;;  %v1323_v13 = vld [vmem:[#allocation5 + $0x3c] ss:$24 sps:$4 sm:$0xff]   ;;  %v1325_v14 = vld [vmem:[#allocation5 + $0x38] ss:$24 sps:$4 sm:$0xff]  }
  0x23   :  { %229 = vmatprep.subr.bf16.mxu0 %v1314_v7  ;;  %272 = vmatprep.subr.bf16.mxu1 %v1317_v9  ;;  %v1326_v15 = vld [vmem:[#allocation5 + $0x4] ss:$24 sps:$4 sm:$0xff]   ;;  %v1328_v17 = vld [vmem:[#allocation5] ss:$24 sps:$4 sm:$0xff]   ;;  %v1535_v22 = vand.u32 127, %v56_v21  ;;  %vm215_vm2 = vcmask 523264  }
  0x24   :  { %62 = vperm.xlu0 %1307, %v55_v2   ;;  %v1329_v16 = vld [vmem:[#allocation5 + $0xc] ss:$24 sps:$4 sm:$0xff]   ;;  %v1331_v18 = vld [vmem:[#allocation5 + $0x8] ss:$24 sps:$4 sm:$0xff]   ;;  %v1344_v20 = vld [vmem:[#allocation8 + $0x78] sm:$0xff]   ;;  %vm997_vm4 = vcmask 130112  }
  0x25   :  { %v1334_v19 = vld [vmem:[#allocation5 + $0xa4] ss:$24 sps:$4 sm:$0xff]   ;;  %v1332_v28 = vld [vmem:[#allocation5 + $0xa0] ss:$24 sps:$4 sm:$0xff]   ;;  %v1337_v30 = vld [vmem:[#allocation5 + $0x74] ss:$24 sps:$4 sm:$0xff]  }
  0x26   :  { %230 = vmatpush1.bf16.msra.mxu0 %v1316_v8  ;;  %273 = vmatpush1.bf16.msra.mxu1 %v1319_v10  ;;  %v1345_v31 = vld [vmem:[#allocation8 + $0x38] sm:$0xff]   ;;  %v1348_v32 = vld [vmem:[#allocation8 + $0x70] sm:$0xff]   ;;  %v1352_v36 = vld [vmem:[#allocation8 + $0x68] sm:$0xff]   ;;  %vm1000_vm5 = vcmask 122880  }
  0x27   :  { %231 = vmatprep.subr.bf16.mxu0 %v1320_v11  ;;  %274 = vmatprep.subr.bf16.mxu1 %v1323_v13  ;;  %v1335_v33 = vld [vmem:[#allocation5 + $0x70] ss:$24 sps:$4 sm:$0xff]   ;;  %v1340_v34 = vld [vmem:[#allocation5 + $0x44] ss:$24 sps:$4 sm:$0xff]   ;;  %v1338_v37 = vld [vmem:[#allocation5 + $0x40] ss:$24 sps:$4 sm:$0xff]  }
  0x28   :  { %v1349_v35 = vld [vmem:[#allocation8 + $0x30] sm:$0xff]   ;;  %v1353_v39 = vld [vmem:[#allocation8 + $0x28] sm:$0xff]   ;;  %v1356_v40 = vld [vmem:[#allocation8 + $0x60] sm:$0xff]  }
  0x29   :  { %v1343_v38 = vld [vmem:[#allocation5 + $0x14] ss:$24 sps:$4 sm:$0xff]   ;;  %v1341_v41 = vld [vmem:[#allocation5 + $0x10] ss:$24 sps:$4 sm:$0xff]   ;;  %v1346_v42 = vld [vmem:[#allocation8 + $0xf8] sm:$0xff]  }
  0x2a   :  { %232 = vmatpush1.bf16.msra.mxu0 %v1322_v12  ;;  %275 = vmatpush1.bf16.msra.mxu1 %v1325_v14  ;;  %v1357_v43 = vld [vmem:[#allocation8 + $0x20] sm:$0xff]   ;;  %v1360_v44 = vld [vmem:[#allocation8 + $0x58] sm:$0xff]   ;;  %v1350_v46 = vld [vmem:[#allocation8 + $0xf0] sm:$0xff]  }
  0x2b   :  { %233 = vmatprep.subr.bf16.mxu0 %v1326_v15  ;;  %276 = vmatprep.subr.bf16.mxu1 %v1329_v16  ;;  %v1347_v45 = vld [vmem:[#allocation8 + $0xb8] sm:$0xff]   ;;  %v1364_v48 = vld [vmem:[#allocation8 + $0x50] sm:$0xff]   ;;  %v1354_v50 = vld [vmem:[#allocation8 + $0xe8] sm:$0xff]  }
  0x2c   :  { %v1361_v47 = vld [vmem:[#allocation8 + $0x18] sm:$0xff]   ;;  %v1351_v49 = vld [vmem:[#allocation8 + $0xb0] sm:$0xff]   ;;  %v1355_v52 = vld [vmem:[#allocation8 + $0xa8] sm:$0xff]  }
  0x2d   :  { %v1365_v51 = vld [vmem:[#allocation8 + $0x10] sm:$0xff]   ;;  %v1358_v53 = vld [vmem:[#allocation8 + $0xe0] sm:$0xff]   ;;  %v1362_v55 = vld [vmem:[#allocation8 + $0xd8] sm:$0xff]  }
  0x2e   :  { %234 = vmatpush1.bf16.msra.mxu0 %v1328_v17  ;;  %277 = vmatpush1.bf16.msra.mxu1 %v1331_v18  ;;  %v1359_v54 = vld [vmem:[#allocation8 + $0xa0] sm:$0xff]   ;;  %v1363_v56 = vld [vmem:[#allocation8 + $0x98] sm:$0xff]   ;;  %v1366_v57 = vld [vmem:[#allocation8 + $0xd0] sm:$0xff]  }
  0x2f   :  { %313 = vmatprep.subr.bf16.mxu0 %v1334_v19  ;;  %1229 = vmatprep.subr.bf16.mxu1 %v1344_v20  ;;  %v1367_v58 = vld [vmem:[#allocation8 + $0x90] sm:$0xff]   ;;  %v1368_v59 = vld [vmem:[#allocation8 + $0x48] sm:$0xff]   ;;  %v1372_v63 = vld [vmem:[#allocation8 + $0x40] sm:$0xff]  }
  0x30   :  { %v1369_v60 = vld [vmem:[#allocation8 + $0x8] sm:$0xff]   ;;  %v1374_v1 = vld [vmem:[#allocation8 + $0xc0] sm:$0xff]   ;;  %v1376_v3 = vld [vmem:[#allocation8 + $0x178] sm:$0xff]  }
  0x31   :  { %v1370_v61 = vld [vmem:[#allocation8 + $0xc8] sm:$0xff]   ;;  %v1375_v2 = vld [vmem:[#allocation8 + $0x80] sm:$0xff]   ;;  %v1377_v14 = vld [vmem:[#allocation8 + $0x138] sm:$0xff]  }
  0x32   :  { %v1371_v62 = vld [vmem:[#allocation8 + $0x88] sm:$0xff]   ;;  %v1378_v17 = vld [vmem:[#allocation8 + $0x170] sm:$0xff]  }
  0x33   :  { %v1379_v18 = vld [vmem:[#allocation8 + $0x130] sm:$0xff]   ;;  %v1380_v19 = vld [vmem:[#allocation8 + $0x168] sm:$0xff]  }
  0x34   :  { %v1381_v20 = vld [vmem:[#allocation8 + $0x128] sm:$0xff]  }
  0x9b   :  { %v60_v23 = vpop.permute.xlu0 %59 }
  0x9c   :  { %vm64_vm0 = vcmp.eq.s32.totalorder %v60_v23, %v1535_v22 }
  0x9d   :  { %v1125_v26 = vsel %vm64_vm0, 1.0, %v1487_v25 }
  0x9f   :  { %v63_v24 = vpop.permute.xlu0 %62 }
  0xa0   :  { %vm65_vm1 = vcmp.eq.s32.totalorder %v63_v24, %v1535_v22  ;;  %v1382_v24 = vld [vmem:[#allocation8 + $0x160] sm:$0xff]  }
  0xa1   :  { %v1126_v27 = vsel %vm65_vm1, 1.0, %v1487_v25 }
  0xa2   :  { %v70_v29 = vpack.c.bf16 %v1126_v27, %v1125_v26  ;;  %v1383_v26 = vld [vmem:[#allocation8 + $0x120] sm:$0xff]  }
  0xa4   :  { %1151 = vmatmul.mubr.msk.bf16.vlgmr.msra.gmra.mxu0 %vm215_vm2, %v70_v29  ;;  %1152 = vmatmul.mubr.msk.bf16.vlgmr.msra.gmra.mxu1 %vm215_vm2, %v70_v29 }
  0xa5   :  { %314 = vmatpush1.bf16.msra.mxu0 %v1332_v28  ;;  %337 = vmatprep.mubr.bf16.mxu0 %v1486_v0  ;;  %v1373_v0 = vld [vmem:[#allocation8] sm:$0xff]   ;;  %v1384_v28 = vld [vmem:[#allocation8 + $0x158] sm:$0xff]  }
  0xa6   :  { %315 = vmatprep.subr.bf16.mxu0 %v1337_v30  ;;  %1230 = vmatpush3.bf16.msra.mxu1 %v1345_v31  ;;  %v1385_v31 = vld [vmem:[#allocation8 + $0x118] sm:$0xff]  }
  0xa7   :  { %1231 = vmatprep.subr.bf16.mxu1 %v1348_v32  ;;  %v1386_v32 = vld [vmem:[#allocation8 + $0x150] sm:$0xff]  }
  0xa9   :  { %316 = vmatpush1.bf16.msra.mxu0 %v1335_v33  ;;  %v1387_v33 = vld [vmem:[#allocation8 + $0x110] sm:$0xff]  }
  0xaa   :  { %317 = vmatprep.subr.bf16.mxu0 %v1340_v34  ;;  %1232 = vmatpush3.bf16.msra.mxu1 %v1349_v35  ;;  %v1388_v34 = vld [vmem:[#allocation8 + $0x148] sm:$0xff]  }
  0xab   :  { %1233 = vmatprep.subr.bf16.mxu1 %v1352_v36  ;;  %v1389_v35 = vld [vmem:[#allocation8 + $0x108] sm:$0xff]   ;;  %v1390_v36 = vld [vmem:[#allocation8 + $0x140] sm:$0xff]  }
  0xad   :  { %318 = vmatpush1.bf16.msra.mxu0 %v1338_v37  ;;  %v1391_v37 = vld [vmem:[#allocation8 + $0x100] sm:$0xff]  }
  0xae   :  { %319 = vmatprep.subr.bf16.mxu0 %v1343_v38  ;;  %1234 = vmatpush3.bf16.msra.mxu1 %v1353_v39 }
  0xaf   :  { %1235 = vmatprep.subr.bf16.mxu1 %v1356_v40 }
  0xb1   :  { %320 = vmatpush1.bf16.msra.mxu0 %v1341_v41 }
  0xb2   :  { %1251 = vmatprep.subr.bf16.mxu0 %v1346_v42  ;;  %1236 = vmatpush3.bf16.msra.mxu1 %v1357_v43 }
  0xb3   :  { %1237 = vmatprep.subr.bf16.mxu1 %v1360_v44 }
  0xb4   :  { %1153 = vmatmul.mubr.msk.bf16.vlgmr.msra.gmra.mxu0 %vm215_vm2, %v70_v29 }
  0xb5   :  { %1252 = vmatpush3.bf16.msra.mxu0 %v1347_v45  ;;  %v1160_v45 = vld [vmem:[%s1562_s3] ss:$0 sm:$0xff]  ;;  %s1488_s3 = smov [#allocation10]  }
  0xb6   :  { %1253 = vmatprep.subr.bf16.mxu0 %v1350_v46  ;;  %1238 = vmatpush3.bf16.msra.mxu1 %v1361_v47  ;;  %s1098_s10 = sshll.u32 %s1488_s3, 4  ;;  %s1099_s10 = int_to_ptr.vmem [resolvable:$true] %s1098_s10 }
  0xb7   :  { %1239 = vmatprep.subr.bf16.mxu1 %v1364_v48  ;;  %s1432_s11 = scalar_lea.vmem %s1099_s10, 256  ;;  %p1437_p11 = scmp.lt.s32.totalorder %s1099_s10, %s1099_s10 }
  0xb8   :  { %p1433_p10 = scmp.ne.s32.totalorder %s1099_s10, %s1432_s11  ;;  %p1438_p12 = scmp.lt.s32.totalorder %s1432_s11, %s1432_s11 }
  0xb9   :  { %1254 = vmatpush3.bf16.msra.mxu0 %v1351_v49 }
  0xba   :  { %1255 = vmatprep.subr.bf16.mxu0 %v1354_v50  ;;  %1240 = vmatpush3.bf16.msra.mxu1 %v1365_v51  ;;  %p1439_p13 = por %p1438_p12, %p1437_p11 }
  0xbb   :  { %1241 = vmatprep.subr.bf16.mxu1 %v1368_v59 }
  0xbc   :  { %p1440_p0 = pnand %p1439_p13, %p1433_p10 }
  0xbd   :  { %1256 = vmatpush3.bf16.msra.mxu0 %v1355_v52 }
  0xbe   :  { %1257 = vmatprep.subr.bf16.mxu0 %v1358_v53  ;;  %1242 = vmatpush3.bf16.msra.mxu1 %v1369_v60 }
  0xbf   :  { %1243 = vmatprep.subr.bf16.mxu1 %v1372_v63 }
  0xc1   :  { %1258 = vmatpush3.bf16.msra.mxu0 %v1359_v54 }
  0xc2   :  { %1259 = vmatprep.subr.bf16.mxu0 %v1362_v55  ;;  %1244 = vmatpush3.bf16.msra.mxu1 %v1373_v0  ;;  %v989_v0 = vshrl.u32 %v56_v21, 7 }
  0xc3   :  { %1273 = vmatprep.subr.bf16.mxu1 %v1376_v3 }
  0xc4   :  { %v990_v3 = vsub.s32 %v1535_v22, %v989_v0 }
  0xc5   :  { %1260 = vmatpush3.bf16.msra.mxu0 %v1363_v56 }
  0xc6   :  { %1261 = vmatprep.subr.bf16.mxu0 %v1366_v57 }
  0xc9   :  { %1262 = vmatpush3.bf16.msra.mxu0 %v1367_v58 }
  0xca   :  { %1263 = vmatprep.subr.bf16.mxu0 %v1370_v61 }
  0xcd   :  { %1264 = vmatpush3.bf16.msra.mxu0 %v1371_v62 }
  0xce   :  { %1265 = vmatprep.subr.bf16.mxu0 %v1374_v1  ;;  %v992_v1 = vadd.s32 4294967288, %v1535_v22 }
  0xd1   :  { %1266 = vmatpush3.bf16.msra.mxu0 %v1375_v2 }
 0x164   :  { %v253_v4 = vpop.f32.mrf.mxu0  ;;  %v296_v5 = vpop.f32.mrf.mxu1 }
 0x166   :  { %v255_v6 = vpop.f32.mrf.mxu0  ;;  %v298_v7 = vpop.f32.mrf.mxu1 }
 0x168   :  { %v257_v8 = vpop.f32.mrf.mxu0  ;;  %v300_v9 = vpop.f32.mrf.mxu1 }
 0x169   :  { %v1223_v15 = vpack.c.bf16 %v257_v8, %v253_v4  ;;  %v1225_v16 = vpack.c.bf16 %v300_v9, %v296_v5  ;;  %v995_v4 = vsub.s32 %v992_v1, %v989_v0 }
 0x16a   :  { %v259_v10 = vpop.f32.mrf.mxu0  ;;  %v302_v11 = vpop.f32.mrf.mxu1 }
 0x16b   :  { %v1224_v12 = vpack.c.bf16 %v259_v10, %v255_v6  ;;  %v1226_v13 = vpack.c.bf16 %v302_v11, %v298_v7 }
 0x16d   :  { %849 = vmatprep.mubr.bf16.mxu1 %v1224_v12  ;;  %890 = vmatprep.mubr.bf16.mxu0 %v1226_v13 }
 0x16e   :  { %850 = vmatmul.mubr.bf16.vlgmr.msra.gmra.mxu1 %v1223_v15  ;;  %891 = vmatmul.mubr.bf16.vlgmr.msra.gmra.mxu0 %v1225_v16 }
 0x16f   :  { %1274 = vmatpush3.bf16.msra.mxu1 %v1377_v14 }
 0x170   :  { %1275 = vmatprep.subr.bf16.mxu1 %v1378_v17 }
 0x173   :  { %1276 = vmatpush3.bf16.msra.mxu1 %v1379_v18 }
 0x174   :  { %v339_v23 = vpop.f32.mrf.mxu0  ;;  %1277 = vmatprep.subr.bf16.mxu1 %v1380_v19 }
 0x176   :  { %v341_v25 = vpop.f32.mrf.mxu0 }
 0x177   :  { %1278 = vmatpush3.bf16.msra.mxu1 %v1381_v20 }
 0x178   :  { %v343_v27 = vpop.f32.mrf.mxu0  ;;  %1279 = vmatprep.subr.bf16.mxu1 %v1382_v24 }
 0x179   :  { %v1227_v38 = vpack.c.bf16 %v343_v27, %v339_v23 }
 0x17a   :  { %v345_v29 = vpop.f32.mrf.mxu0 }
 0x17b   :  { %v1228_v30 = vpack.c.bf16 %v345_v29, %v341_v25  ;;  %1280 = vmatpush3.bf16.msra.mxu1 %v1383_v26 }
 0x17c   :  { %1281 = vmatprep.subr.bf16.mxu1 %v1384_v28 }
 0x17d   :  { %931 = vmatprep.mubr.bf16.mxu1 %v1228_v30 }
 0x17f   :  { %1282 = vmatpush3.bf16.msra.mxu1 %v1385_v31 }
 0x180   :  { %1283 = vmatprep.subr.bf16.mxu1 %v1386_v32 }
 0x183   :  { %1284 = vmatpush3.bf16.msra.mxu1 %v1387_v33 }
 0x184   :  { %1285 = vmatprep.subr.bf16.mxu1 %v1388_v34 }
 0x187   :  { %1286 = vmatpush3.bf16.msra.mxu1 %v1389_v35 }
 0x188   :  { %1287 = vmatprep.subr.bf16.mxu1 %v1390_v36 }
 0x18b   :  { %1288 = vmatpush3.bf16.msra.mxu1 %v1391_v37 }
 0x18e   :  { %932 = vmatmul.mubr.bf16.vlgmr.msra.gmra.mxu1 %v1227_v38 }
 0x22e   :  { %v1245_v39 = vpop.f32.mrf.mxu1  ;;  %v1267_v41 = vpop.f32.mrf.mxu0 }
 0x230   :  { %v1246_v40 = vpop.f32.mrf.mxu1  ;;  %v1268_v43 = vpop.f32.mrf.mxu0 }
 0x231   :  { %v1247_v44 = vadd.f32 %v1246_v40, %v1245_v39  ;;  %v1269_v51 = vadd.f32 %v1268_v43, %v1267_v41 }
 0x232   :  { %v1248_v42 = vpop.f32.mrf.mxu1  ;;  %v1270_v47 = vpop.f32.mrf.mxu0 }
 0x233   :  { %v852_v48 = vadd.f32 %v1247_v44, %v1160_v45 }
 0x234   :  { %v1249_v46 = vpop.f32.mrf.mxu1  ;;  %v1271_v52 = vpop.f32.mrf.mxu0 }
 0x235   :  { %v1250_v49 = vadd.f32 %v1249_v46, %v1248_v42  ;;  %v893_v54 = vadd.f32 %v1269_v51, %v852_v48  ;;  %v1272_v58 = vadd.f32 %v1271_v52, %v1270_v47 }
 0x237   :  { %v855_v55 = vadd.f32 %v1250_v49, %v1160_v45 }
 0x239   :  { %v896_v61 = vadd.f32 %v1272_v58, %v855_v55 }
 0x24e   :  { %v1289_v50 = vpop.f32.mrf.mxu1 }
 0x250   :  { %v1290_v53 = vpop.f32.mrf.mxu1 }
 0x251   :  { %v1291_v56 = vadd.f32 %v1290_v53, %v1289_v50 }
 0x252   :  { %v1292_v57 = vpop.f32.mrf.mxu1 }
 0x253   :  { %v934_v59 = vadd.f32 %v1291_v56, %v893_v54 }
 0x254   :  { %v1293_v60 = vpop.f32.mrf.mxu1 }
 0x255   :  { %940 = vst [vmem:[#allocation10] sm:$0xff] %v934_v59  ;;  %v1294_v62 = vadd.f32 %v1293_v60, %v1292_v57  ;;  %947 = vmax.xlane.f32.xlu1 %v934_v59 }
 0x257   :  { %v937_v63 = vadd.f32 %v1294_v62, %v896_v61 }
 0x259   :  { %941 = vst [vmem:[#allocation10 + $0x8] sm:$0xff] %v937_v63  ;;  %949 = vmax.xlane.f32.xlu1 %v937_v63 }
 0x2de   :  { %v948_v2 = vpop.xlane.xlu1 %947 }
 0x2df   :  { %vm951_vm3 = vcmp.eq.f32.partialorder %v934_v59, %v948_v2 }
 0x2e0   :  { %v953_v5 = vsel %vm951_vm3, %v1535_v22, 2147483647 }
 0x2e1   :  { %v956_v6 = vshra.s32 %v953_v5, 16  ;;  %v955_v11 = vand.u32 65535, %v953_v5 }
 0x2e2   :  { %v950_v7 = vpop.xlane.xlu1 %949 }
 0x2e3   :  { %vm952_vm6 = vcmp.eq.f32.partialorder %v937_v63, %v950_v7  ;;  %v958_v8 = vcvt.s32.f32 %v956_v6  ;;  %v957_v13 = vcvt.s32.f32 %v955_v11 }
 0x2e4   :  { %v954_v9 = vsel %vm952_vm6, %v1535_v22, 2147483647 }
 0x2e5   :  { %959 = vmin.xlane.f32.xlu0 %v958_v8  ;;  %v970_v10 = vshra.s32 %v954_v9, 16  ;;  %v969_v14 = vand.u32 65535, %v954_v9 }
 0x2e7   :  { %v972_v21 = vcvt.s32.f32 %v970_v10  ;;  %v971_v17 = vcvt.s32.f32 %v969_v14 }
 0x2e9   :  { %973 = vmin.xlane.f32.xlu1 %v972_v21 }
 0x36e   :  { %v960_v12 = vpop.xlane.xlu0 %959 }
 0x36f   :  { %vm961_vm7 = vcmp.eq.f32.partialorder %v958_v8, %v960_v12 }
 0x370   :  { %v962_v15 = vsel %vm961_vm7, %v957_v13, inf }
 0x371   :  { %963 = vmin.xlane.f32.xlu1 %v962_v15 }
 0x372   :  { %v974_v16 = vpop.xlane.xlu1 %973 }
 0x373   :  { %vm975_vm8 = vcmp.eq.f32.partialorder %v972_v21, %v974_v16 }
 0x374   :  { %v976_v18 = vsel %vm975_vm8, %v971_v17, inf }
 0x375   :  { %977 = vmin.xlane.f32.xlu1 %v976_v18 }
 0x376   :  { %1443 = shalt.err (!%p1440_p0)
}
 0x377   :  { %s1489_s12 = smov 128   ;;  %s1490_s13 = smov 8   ;;  %v966_v22 = vcvt.f32.s32 %v960_v12  ;;  %v980_v20 = vcvt.f32.s32 %v974_v16 }
 0x378   :  { %1104 = dma.vmem_to_hbm [thread:$0]  %s1099_s10, 256, %s1563_s4, [#allocation7], %s1489_s12, %s1489_s12, %s1490_s13  }
 0x379   :  { %v967_v24 = vshll.u32 %v966_v22, 16  ;;  %v981_v26 = vshll.u32 %v980_v20, 16  ;;  %s1491_s16 = smov [#allocation11]  }
 0x37a   :  { %s1111_s17 = sshll.u32 %s1491_s16, 4  ;;  %s1112_s17 = int_to_ptr.vmem [resolvable:$true] %s1111_s17 }
 0x37b   :  { %s1452_s4 = scalar_lea.vmem %s1112_s17, 16  ;;  %s1456_s18 = scalar_lea.vmem %s1112_s17, 32 }
 0x37c   :  { %p1453_p1 = scmp.ne.s32.totalorder %s1112_s17, %s1452_s4  ;;  %p1457_p2 = scmp.lt.s32.totalorder %s1112_s17, %s1112_s17 }
 0x37d   :  { %p1458_p3 = scmp.lt.s32.totalorder %s1456_s18, %s1452_s4 }
 0x37f   :  { %p1459_p4 = por %p1458_p3, %p1457_p2 }
 0x381   :  { %p1460_p5 = pnand %p1459_p4, %p1453_p1 }
 0x3fa   :  { %v964_v19 = vpop.xlane.xlu1 %963 }
 0x3fb   :  { %v965_v23 = vcvt.f32.s32 %v964_v19 }
 0x3fd   :  { %v968_v27 = vadd.s32 %v967_v24, %v965_v23 }
 0x3fe   :  { %v978_v25 = vpop.xlane.xlu1 %977 }
 0x3ff   :  { %v979_v28 = vcvt.f32.s32 %v978_v25  ;;  %v1005_v30 = vrot.slane %v968_v27, %v990_v3 }
 0x401   :  { %v982_v29 = vadd.s32 %v981_v26, %v979_v28 }
 0x403   :  { %v1009_v31 = vrot.slane %v982_v29, %v995_v4 }
 0x405   :  { %v1010_v32 = vsel %vm997_vm4, %v1009_v31, %v1005_v30 }
 0x406   :  { %1011 = vst.msk [vmem:[#allocation4] sm:$0x1] %vm1000_vm5, %v1010_v32 }
 0x40d   :  { %v1090_v33 = vld [vmem:[#allocation4] sm:$0x1] }
 0x40e   :  { %1092 = vst.msk [vmem:[#allocation11] sm:$0x1] %vm1000_vm5, %v1090_v33 }
 0x40f   :  { %1463 = shalt.err (!%p1460_p5)
}
 0x410   :  { %1114 = dma.vmem_to_hbm [thread:$0]  %s1112_s17, 16, %s1564_s5, [#allocation12]  }
 0x411   :  { %1476 = dma.done.wait [#allocation7], 256  }
 0x412   :  { %1477 = vsyncadd [#allocation7], 4294967040 }
 0x413   :  { %1478 = dma.done.wait [#allocation12], 16  }
 0x414   :  { %1479 = vsyncadd [#allocation12], 4294967280 }
 0x415   :  { %1121 = vsyncpa [#allocation6], 1 }
 0x416   :  { %1122 = vsyncpa [#allocation9], 1 }
 0x417   :  { %1123 = vsyncpa [#allocation7], 1 }
 0x418   :  { %1124 = vsyncpa [#allocation12], 1 }

</bundles_post_ra>
